<compile_context>
chip_gen: v5e
topology: v5e:2x2
jax: 0.10.0
libtpu: 0.0.40
codegen_flags: <defaults>
</compile_context>

<pallas_src>
import math

import jax
import jax.numpy as jnp
from jax import lax
from jax.experimental import pallas as pl
from jax.experimental.pallas import tpu as pltpu

# ---- nms_policy config (deterministic, no learned weights in this module) ----
NUM = 2            # nms_policy.NUM   (hnms1 hash count)
NUM2 = 0           # nms_policy.NUM2  (hnms2 disabled)
WH0 = 16.0         # nms_policy.WH0
ALPHA = 1.8        # nms_policy.ALPHA
GAMMA = 0.5        # nms_policy.GAMMA
THRESH = 0.5       # nms_policy.THRESH (final rerank NMS IoU threshold)
MAX_PROPOSALS = 32
N_BOXES = 128

_LOG_ALPHA = math.log(ALPHA)
_INV_LOG_ALPHA = 1.0 / _LOG_ALPHA
# int32 packing of two quantized dims per code: qw/qh in [-2048, 2047],
# qx/qy (biased) in [0, 2^20) -> code spans exactly the int32 range, no overflow.
_QBITS = 1 << 20
_QHALF = 1 << 19


# --------------------- fused hnms + greedy-NMS core kernel -----------------------
def _compose_hnms_kernel(geom_r_ref, geom_c_ref, code_r_ref, code_c_ref, keep_ref):
    """Per grid step (one image); boxes already sorted by score descending.

    geom_r_ref: (1, 5, n) f32 rows    : x1, y1, x2, y2, area   (lane-dense)
    geom_c_ref: (1, n, 5) f32 columns : same values, transposed (bitwise identical)
    code_r_ref: (1, 2*NUM, n) i32 rows    : packed hash codes
    code_c_ref: (1, n, 2*NUM) i32 columns : same values, transposed
    keep_ref  : (1, 1, n) f32 output keep mask (hnms AND greedy NMS)
    """
    n = geom_r_ref.shape[2]

    gr = geom_r_ref[0]                                   # (5, n)
    gc = geom_c_ref[0]                                   # (n, 5)
    cr = code_r_ref[0]                                   # (2*NUM, n)
    cc = code_c_ref[0]                                   # (n, 2*NUM)

    x1_r, y1_r, x2_r, y2_r, area_r = (gr[0:1, :], gr[1:2, :], gr[2:3, :],
                                      gr[3:4, :], gr[4:5, :])
    x1_c, y1_c, x2_c, y2_c, area_c = (gc[:, 0:1], gc[:, 1:2], gc[:, 2:3],
                                      gc[:, 3:4], gc[:, 4:5])

    # strict upper triangle: sublane index (earlier == higher score after the sort)
    # is a potential suppressor of lane index.
    sub_idx = lax.broadcasted_iota(jnp.int32, (n, n), 0)
    lane_idx = lax.broadcasted_iota(jnp.int32, (n, n), 1)
    earlier = sub_idx < lane_idx

    # ---- hnms1: suppressed if ANY hash cell matches a higher-score box ----
    same_any = None
    for k in range(NUM):
        same_k = ((cc[:, 2 * k:2 * k + 1] == cr[2 * k:2 * k + 1, :]) &
                  (cc[:, 2 * k + 1:2 * k + 2] == cr[2 * k + 1:2 * k + 2, :]))  # (n, n)
        same_any = same_k if same_any is None else (same_any | same_k)

    ones8 = jnp.ones((8, n), jnp.bfloat16)
    hmask = jnp.where(same_any & earlier, 1.0, 0.0).astype(jnp.bfloat16)       # (n, n)
    # MXU column-reduce instead of XLU sublane max-reduce (8 identical rows to
    # stay on the native >=8-sublane matmul path).
    hsup = jnp.dot(ones8, hmask, preferred_element_type=jnp.float32)           # (8, n)
    keep0 = jnp.where(hsup < 0.5, 1.0, 0.0)                                    # (8, n)

    # ---- greedy IoU NMS: thresholded bf16 suppression matrix (no divide),
    #      strict upper triangle folded in ----
    iw = jnp.maximum(jnp.minimum(x2_c, x2_r) - jnp.maximum(x1_c, x1_r), 0.0)
    ih = jnp.maximum(jnp.minimum(y2_c, y2_r) - jnp.maximum(y1_c, y1_r), 0.0)
    inter = iw * ih
    union = area_c + area_r - inter
    sup = jnp.where((inter > THRESH * union) & earlier, 1.0, 0.0
                    ).astype(jnp.bfloat16)                                     # (n, n)

    # ---- greedy NMS as an MXU matvec fixpoint (exact; early-exit on convergence,
    #      hard cap at n iterations guarantees the greedy solution) ----
    def cond(carry):
        it, _, changed = carry
        return jnp.logical_and(changed, it < n)

    def body(carry):
        it, keep, _ = carry
        suppressed = jnp.dot(keep.astype(jnp.bfloat16), sup,
                             preferred_element_type=jnp.float32)               # (8, n)
        keep_new = keep0 * jnp.where(suppressed < 0.5, 1.0, 0.0)
        changed = jnp.max(jnp.abs(keep_new - keep)) > 0.0
        return it + 1, keep_new, changed

    _, keep_final, _ = lax.while_loop(cond, body,
                                      (jnp.int32(0), keep0, jnp.bool_(True)))
    keep_ref[0] = keep_final[0:1, :]


# ----------------------------- Full forward --------------------------------
def boxlist_compose_hnms_forward(boxes_cxywh, scores, max_proposals=MAX_PROPOSALS):
    """boxes_cxywh: (B, N, 4) float32 cxywh; scores: (B, N) float32.
    Returns (out_boxes_xyxy [B, max_proposals, 4], out_scores [B, max_proposals],
             num_out [B])."""
    batch, n, _ = boxes_cxywh.shape

    # rerank (BoxListNMS) sorts by score; the hnms keep set is order independent, so
    # sort once up front (stable -> equal-score ties keep original-index order).
    # TODO(synk): the reference per-cell argmax tie-break for equal scores may differ.
    order = jnp.argsort(-scores, axis=-1)
    boxes_sorted = jnp.take_along_axis(boxes_cxywh, order[..., None], axis=1)  # (B,N,4)
    scores_sorted = jnp.take_along_axis(scores, order, axis=1)                 # (B,N)

    cx = boxes_sorted[..., 0]
    cy = boxes_sorted[..., 1]
    w = boxes_sorted[..., 2]
    h = boxes_sorted[..., 3]

    # geometry (xyxy + area); boxlist_nms_no_convert_back leaves the output in xyxy.
    x1 = cx - 0.5 * w
    y1 = cy - 0.5 * h
    x2 = cx + 0.5 * w
    y2 = cy + 0.5 * h
    area = (x2 - x1) * (y2 - y1)
    geom = jnp.stack([x1, y1, x2, y2, area], axis=1)                           # (B,5,N)

    # exact int32 hash codes (two quantized dims packed per code, 2 codes per hash).
    # TODO(synk): exact per-hash offset scheme of qd.hnms.MultiHashNMSAnyKPt is not
    #             public; evenly spaced offsets k/NUM on all quantized dims are used.
    # TODO(synk): degenerate (w<=0 or h<=0) boxes are clamped positive before log;
    #             the reference's behavior for such boxes is unspecified.
    w_safe = jnp.maximum(w, 1e-6)
    h_safe = jnp.maximum(h, 1e-6)
    lw = jnp.log(w_safe * (1.0 / WH0)) * _INV_LOG_ALPHA
    lh = jnp.log(h_safe * (1.0 / WH0)) * _INV_LOG_ALPHA

    def pack(qa, qb):
        qa_i = jnp.clip(qa, -2048.0, 2047.0).astype(jnp.int32)
        qb_i = jnp.clip(qb, float(-_QHALF), float(_QHALF - 1)).astype(jnp.int32) + _QHALF
        return qa_i * _QBITS + qb_i

    code_rows = []
    for k in range(NUM):
        off = float(k) / float(NUM)
        qw = jnp.floor(lw + off)
        qh = jnp.floor(lh + off)
        cell_w = WH0 * jnp.exp(qw * _LOG_ALPHA)
        cell_h = WH0 * jnp.exp(qh * _LOG_ALPHA)
        qx = jnp.floor(cx / (GAMMA * cell_w) + off)
        qy = jnp.floor(cy / (GAMMA * cell_h) + off)
        code_rows.append(pack(qw, qx))
        code_rows.append(pack(qh, qy))
    codes = jnp.stack(code_rows, axis=1)                                       # (B,2*NUM,N)

    geom_c = jnp.swapaxes(geom, 1, 2)                                          # (B,N,5)
    codes_c = jnp.swapaxes(codes, 1, 2)                                        # (B,N,2*NUM)

    keep_f = pl.pallas_call(
        _compose_hnms_kernel,
        out_shape=jax.ShapeDtypeStruct((batch, 1, n), jnp.float32),
        grid=(batch,),
        in_specs=[
            pl.BlockSpec((1, 5, n), lambda i: (i, 0, 0)),
            pl.BlockSpec((1, n, 5), lambda i: (i, 0, 0)),
            pl.BlockSpec((1, 2 * NUM, n), lambda i: (i, 0, 0)),
            pl.BlockSpec((1, n, 2 * NUM), lambda i: (i, 0, 0)),
        ],
        out_specs=pl.BlockSpec((1, 1, n), lambda i: (i, 0, 0)),
        compiler_params=pltpu.CompilerParams(dimension_semantics=("parallel",)),
    )(geom, geom_c, codes, codes_c)

    keep_raw = keep_f[:, 0, :] > 0.5                                           # (B, N)

    # cap to max_proposals (torch nms keep indices are score-ordered -> first M kept)
    cum = jnp.cumsum(keep_raw.astype(jnp.int32), axis=-1)
    keep = keep_raw & (cum <= max_proposals)
    num_out = jnp.sum(keep.astype(jnp.int32), axis=-1)

    # compact kept entries (score order) into fixed-size padded outputs via
    # cumsum-prefix positions + one-hot matmul (no second argsort).
    # TODO(synk): dynamic-length BoxList output has no fixed-shape equivalent;
    #             emitted as (max_proposals)-padded arrays + per-image count.
    pos = cum - 1                                                              # (B, N)
    slot = jnp.arange(max_proposals, dtype=jnp.int32)[None, :, None]           # (1,M,1)
    sel = (pos[:, None, :] == slot) & keep[:, None, :]                         # (B,M,N)
    sel_f = sel.astype(jnp.float32)
    xyxy = jnp.stack([x1, y1, x2, y2], axis=-1)                                # (B,N,4)
    out_boxes = jnp.einsum('bmn,bnd->bmd', sel_f, xyxy)                        # (B,M,4)
    out_scores = jnp.einsum('bmn,bn->bm', sel_f, scores_sorted)                # (B,M)
    return out_boxes, out_scores, num_out


if __name__ == "__main__":
    key = jax.random.PRNGKey(0)
    k1, k2, k3 = jax.random.split(key, 3)
    B, n = 2, N_BOXES
    centers = jax.random.uniform(k1, (B, n, 2), jnp.float32, 16.0, 304.0)
    wh = jax.random.uniform(k2, (B, n, 2), jnp.float32, 8.0, 64.0)
    boxes_cxywh = jnp.concatenate([centers, wh], axis=-1)    # (B, n, 4) cxywh
    scores = jax.random.uniform(k3, (B, n), jnp.float32)     # score_field="scores"

    fwd = jax.jit(boxlist_compose_hnms_forward)
    out_boxes, out_scores, num_out = fwd(boxes_cxywh, scores)
    jax.block_until_ready((out_boxes, out_scores, num_out))
    print("KERNEL_OK")
</pallas_src>

<mosaic_0001>
module attributes {stable_mosaic.version = 11 : i64} {
  func.func @_compose_hnms_kernel(%arg0: i32, %arg1: memref<1x5x128xf32, #tpu.memory_space<vmem>>, %arg2: memref<1x128x5xf32, #tpu.memory_space<vmem>>, %arg3: memref<1x4x128xi32, #tpu.memory_space<vmem>>, %arg4: memref<1x128x4xi32, #tpu.memory_space<vmem>>, %arg5: memref<1x1x128xf32, #tpu.memory_space<vmem>>) attributes {dimension_semantics = [#tpu.dimension_semantics<parallel>], iteration_bounds = array<i64: 2>, scalar_prefetch = 0 : i64, scratch_operands = 0 : i64, tpu.core_type = #tpu.core_type<tc>, window_params = [{transform_indices = @transform_0, window_bounds = array<i64: 1, 5, 128>}, {transform_indices = @transform_1, window_bounds = array<i64: 1, 128, 5>}, {transform_indices = @transform_2, window_bounds = array<i64: 1, 4, 128>}, {transform_indices = @transform_3, window_bounds = array<i64: 1, 128, 4>}, {transform_indices = @transform_4, window_bounds = array<i64: 1, 1, 128>}]} {
    %c0 = arith.constant 0 : index
    %c0_0 = arith.constant 0 : index
    %c0_1 = arith.constant 0 : index
    %0 = vector.load %arg1[%c0, %c0_0, %c0_1] : memref<1x5x128xf32, #tpu.memory_space<vmem>>, vector<1x5x128xf32>
    %1 = vector.shape_cast %0 : vector<1x5x128xf32> to vector<5x128xf32>
    %c0_2 = arith.constant 0 : index
    %c0_3 = arith.constant 0 : index
    %c0_4 = arith.constant 0 : index
    %2 = vector.load %arg2[%c0_2, %c0_3, %c0_4] : memref<1x128x5xf32, #tpu.memory_space<vmem>>, vector<1x128x5xf32>
    %3 = vector.shape_cast %2 : vector<1x128x5xf32> to vector<128x5xf32>
    %c0_5 = arith.constant 0 : index
    %c0_6 = arith.constant 0 : index
    %c0_7 = arith.constant 0 : index
    %4 = vector.load %arg3[%c0_5, %c0_6, %c0_7] : memref<1x4x128xi32, #tpu.memory_space<vmem>>, vector<1x4x128xi32>
    %5 = vector.shape_cast %4 : vector<1x4x128xi32> to vector<4x128xi32>
    %c0_8 = arith.constant 0 : index
    %c0_9 = arith.constant 0 : index
    %c0_10 = arith.constant 0 : index
    %6 = vector.load %arg4[%c0_8, %c0_9, %c0_10] : memref<1x128x4xi32, #tpu.memory_space<vmem>>, vector<1x128x4xi32>
    %7 = vector.shape_cast %6 : vector<1x128x4xi32> to vector<128x4xi32>
    %8 = vector.extract_strided_slice %1 {offsets = [0, 0], sizes = [1, 128], strides = [1, 1]} : vector<5x128xf32> to vector<1x128xf32>
    %9 = vector.extract_strided_slice %1 {offsets = [1, 0], sizes = [1, 128], strides = [1, 1]} : vector<5x128xf32> to vector<1x128xf32>
    %10 = vector.extract_strided_slice %1 {offsets = [2, 0], sizes = [1, 128], strides = [1, 1]} : vector<5x128xf32> to vector<1x128xf32>
    %11 = vector.extract_strided_slice %1 {offsets = [3, 0], sizes = [1, 128], strides = [1, 1]} : vector<5x128xf32> to vector<1x128xf32>
    %12 = vector.extract_strided_slice %1 {offsets = [4, 0], sizes = [1, 128], strides = [1, 1]} : vector<5x128xf32> to vector<1x128xf32>
    %13 = vector.extract_strided_slice %3 {offsets = [0, 0], sizes = [128, 1], strides = [1, 1]} : vector<128x5xf32> to vector<128x1xf32>
    %14 = vector.extract_strided_slice %3 {offsets = [0, 1], sizes = [128, 1], strides = [1, 1]} : vector<128x5xf32> to vector<128x1xf32>
    %15 = vector.extract_strided_slice %3 {offsets = [0, 2], sizes = [128, 1], strides = [1, 1]} : vector<128x5xf32> to vector<128x1xf32>
    %16 = vector.extract_strided_slice %3 {offsets = [0, 3], sizes = [128, 1], strides = [1, 1]} : vector<128x5xf32> to vector<128x1xf32>
    %17 = vector.extract_strided_slice %3 {offsets = [0, 4], sizes = [128, 1], strides = [1, 1]} : vector<128x5xf32> to vector<128x1xf32>
    %18 = tpu.iota {dimensions = array<i32: 0>} : vector<128x128xi32>
    %19 = tpu.iota {dimensions = array<i32: 1>} : vector<128x128xi32>
    %20 = arith.cmpi slt, %18, %19 : vector<128x128xi32>
    %21 = vector.extract_strided_slice %7 {offsets = [0, 0], sizes = [128, 1], strides = [1, 1]} : vector<128x4xi32> to vector<128x1xi32>
    %22 = vector.extract_strided_slice %5 {offsets = [0, 0], sizes = [1, 128], strides = [1, 1]} : vector<4x128xi32> to vector<1x128xi32>
    %23 = vector.broadcast %21 : vector<128x1xi32> to vector<128x128xi32>
    %24 = vector.broadcast %22 : vector<1x128xi32> to vector<128x128xi32>
    %25 = arith.cmpi eq, %23, %24 : vector<128x128xi32>
    %26 = vector.extract_strided_slice %7 {offsets = [0, 1], sizes = [128, 1], strides = [1, 1]} : vector<128x4xi32> to vector<128x1xi32>
    %27 = vector.extract_strided_slice %5 {offsets = [1, 0], sizes = [1, 128], strides = [1, 1]} : vector<4x128xi32> to vector<1x128xi32>
    %28 = vector.broadcast %26 : vector<128x1xi32> to vector<128x128xi32>
    %29 = vector.broadcast %27 : vector<1x128xi32> to vector<128x128xi32>
    %30 = arith.cmpi eq, %28, %29 : vector<128x128xi32>
    %31 = arith.andi %25, %30 : vector<128x128xi1>
    %32 = vector.extract_strided_slice %7 {offsets = [0, 2], sizes = [128, 1], strides = [1, 1]} : vector<128x4xi32> to vector<128x1xi32>
    %33 = vector.extract_strided_slice %5 {offsets = [2, 0], sizes = [1, 128], strides = [1, 1]} : vector<4x128xi32> to vector<1x128xi32>
    %34 = vector.broadcast %32 : vector<128x1xi32> to vector<128x128xi32>
    %35 = vector.broadcast %33 : vector<1x128xi32> to vector<128x128xi32>
    %36 = arith.cmpi eq, %34, %35 : vector<128x128xi32>
    %37 = vector.extract_strided_slice %7 {offsets = [0, 3], sizes = [128, 1], strides = [1, 1]} : vector<128x4xi32> to vector<128x1xi32>
    %38 = vector.extract_strided_slice %5 {offsets = [3, 0], sizes = [1, 128], strides = [1, 1]} : vector<4x128xi32> to vector<1x128xi32>
    %39 = vector.broadcast %37 : vector<128x1xi32> to vector<128x128xi32>
    %40 = vector.broadcast %38 : vector<1x128xi32> to vector<128x128xi32>
    %41 = arith.cmpi eq, %39, %40 : vector<128x128xi32>
    %42 = arith.andi %36, %41 : vector<128x128xi1>
    %43 = arith.ori %31, %42 : vector<128x128xi1>
    %cst = arith.constant 1.000000e+00 : bf16
    %44 = vector.broadcast %cst : bf16 to vector<8x128xbf16>
    %45 = arith.andi %43, %20 : vector<128x128xi1>
    %cst_11 = arith.constant 1.000000e+00 : f32
    %cst_12 = arith.constant 0.000000e+00 : f32
    %46 = vector.broadcast %cst_11 : f32 to vector<128x128xf32>
    %47 = vector.broadcast %cst_12 : f32 to vector<128x128xf32>
    %48 = arith.select %45, %46, %47 : vector<128x128xi1>, vector<128x128xf32>
    %49 = arith.truncf %48 : vector<128x128xf32> to vector<128x128xbf16>
    %cst_13 = arith.constant dense<0.000000e+00> : vector<8x128xf32>
    %50 = tpu.matmul %44, %49, %cst_13 {dimension_numbers = #tpu.dot_dimension_numbers<[1], [0], [0], [1], [0, 0, 1, 1], [], []>} : vector<8x128xbf16>, vector<128x128xbf16>, vector<8x128xf32> -> vector<8x128xf32>
    %cst_14 = arith.constant 5.000000e-01 : f32
    %51 = vector.broadcast %cst_14 : f32 to vector<8x128xf32>
    %52 = arith.cmpf olt, %50, %51 : vector<8x128xf32>
    %cst_15 = arith.constant 1.000000e+00 : f32
    %cst_16 = arith.constant 0.000000e+00 : f32
    %53 = vector.broadcast %cst_15 : f32 to vector<8x128xf32>
    %54 = vector.broadcast %cst_16 : f32 to vector<8x128xf32>
    %55 = arith.select %52, %53, %54 : vector<8x128xi1>, vector<8x128xf32>
    %56 = vector.broadcast %15 : vector<128x1xf32> to vector<128x128xf32>
    %57 = vector.broadcast %10 : vector<1x128xf32> to vector<128x128xf32>
    %58 = arith.minimumf %56, %57 : vector<128x128xf32>
    %59 = vector.broadcast %13 : vector<128x1xf32> to vector<128x128xf32>
    %60 = vector.broadcast %8 : vector<1x128xf32> to vector<128x128xf32>
    %61 = arith.maximumf %59, %60 : vector<128x128xf32>
    %62 = arith.subf %58, %61 : vector<128x128xf32>
    %cst_17 = arith.constant 0.000000e+00 : f32
    %63 = vector.broadcast %cst_17 : f32 to vector<128x128xf32>
    %64 = arith.maximumf %62, %63 : vector<128x128xf32>
    %65 = vector.broadcast %16 : vector<128x1xf32> to vector<128x128xf32>
    %66 = vector.broadcast %11 : vector<1x128xf32> to vector<128x128xf32>
    %67 = arith.minimumf %65, %66 : vector<128x128xf32>
    %68 = vector.broadcast %14 : vector<128x1xf32> to vector<128x128xf32>
    %69 = vector.broadcast %9 : vector<1x128xf32> to vector<128x128xf32>
    %70 = arith.maximumf %68, %69 : vector<128x128xf32>
    %71 = arith.subf %67, %70 : vector<128x128xf32>
    %cst_18 = arith.constant 0.000000e+00 : f32
    %72 = vector.broadcast %cst_18 : f32 to vector<128x128xf32>
    %73 = arith.maximumf %71, %72 : vector<128x128xf32>
    %74 = arith.mulf %64, %73 : vector<128x128xf32>
    %75 = vector.broadcast %17 : vector<128x1xf32> to vector<128x128xf32>
    %76 = vector.broadcast %12 : vector<1x128xf32> to vector<128x128xf32>
    %77 = arith.addf %75, %76 : vector<128x128xf32>
    %78 = arith.subf %77, %74 : vector<128x128xf32>
    %cst_19 = arith.constant 5.000000e-01 : f32
    %79 = vector.broadcast %cst_19 : f32 to vector<128x128xf32>
    %80 = arith.mulf %79, %78 : vector<128x128xf32>
    %81 = arith.cmpf ogt, %74, %80 : vector<128x128xf32>
    %82 = arith.andi %81, %20 : vector<128x128xi1>
    %cst_20 = arith.constant 1.000000e+00 : f32
    %cst_21 = arith.constant 0.000000e+00 : f32
    %83 = vector.broadcast %cst_20 : f32 to vector<128x128xf32>
    %84 = vector.broadcast %cst_21 : f32 to vector<128x128xf32>
    %85 = arith.select %82, %83, %84 : vector<128x128xi1>, vector<128x128xf32>
    %86 = arith.truncf %85 : vector<128x128xf32> to vector<128x128xbf16>
    %c0_i32 = arith.constant 0 : i32
    %true = arith.constant true
    %87:3 = scf.while (%arg6 = %c0_i32, %arg7 = %55, %arg8 = %true) : (i32, vector<8x128xf32>, i1) -> (i32, vector<8x128xf32>, i1) {
      %c128_i32 = arith.constant 128 : i32
      %92 = arith.cmpi slt, %arg6, %c128_i32 : i32
      %93 = arith.andi %arg8, %92 : i1
      scf.condition(%93) %arg6, %arg7, %arg8 : i32, vector<8x128xf32>, i1
    } do {
    ^bb0(%arg6: i32, %arg7: vector<8x128xf32>, %arg8: i1):
      %92 = arith.truncf %arg7 : vector<8x128xf32> to vector<8x128xbf16>
      %cst_25 = arith.constant dense<0.000000e+00> : vector<8x128xf32>
      %93 = tpu.matmul %92, %86, %cst_25 {dimension_numbers = #tpu.dot_dimension_numbers<[1], [0], [0], [1], [0, 0, 1, 1], [], []>} : vector<8x128xbf16>, vector<128x128xbf16>, vector<8x128xf32> -> vector<8x128xf32>
      %cst_26 = arith.constant 5.000000e-01 : f32
      %94 = vector.broadcast %cst_26 : f32 to vector<8x128xf32>
      %95 = arith.cmpf olt, %93, %94 : vector<8x128xf32>
      %cst_27 = arith.constant 1.000000e+00 : f32
      %cst_28 = arith.constant 0.000000e+00 : f32
      %96 = vector.broadcast %cst_27 : f32 to vector<8x128xf32>
      %97 = vector.broadcast %cst_28 : f32 to vector<8x128xf32>
      %98 = arith.select %95, %96, %97 : vector<8x128xi1>, vector<8x128xf32>
      %99 = arith.mulf %55, %98 : vector<8x128xf32>
      %100 = arith.subf %99, %arg7 : vector<8x128xf32>
      %101 = math.absf %100 : vector<8x128xf32>
      %102 = vector.shape_cast %101 : vector<8x128xf32> to vector<1x8x128xf32>
      %cst_29 = arith.constant dense<0xFF800000> : vector<1xf32>
      %103 = vector.multi_reduction <maximumf>, %102, %cst_29 [1, 2] : vector<1x8x128xf32> to vector<1xf32>
      %104 = vector.shape_cast %103 : vector<1xf32> to vector<1x1x1xf32>
      %105 = vector.extract %104[0, 0, 0] : f32 from vector<1x1x1xf32>
      %cst_30 = arith.constant 0.000000e+00 : f32
      %106 = arith.cmpf ogt, %105, %cst_30 : f32
      %c1_i32 = arith.constant 1 : i32
      %107 = arith.addi %arg6, %c1_i32 : i32
      scf.yield %107, %99, %106 : i32, vector<8x128xf32>, i1
    }
    %88 = vector.extract_strided_slice %87#1 {offsets = [0, 0], sizes = [1, 128], strides = [1, 1]} : vector<8x128xf32> to vector<1x128xf32>
    %c0_22 = arith.constant 0 : index
    %c0_23 = arith.constant 0 : index
    %c0_24 = arith.constant 0 : index
    %89 = vector.load %arg5[%c0_22, %c0_23, %c0_24] : memref<1x1x128xf32, #tpu.memory_space<vmem>>, vector<1x1x128xf32>
    %90 = vector.shape_cast %89 : vector<1x1x128xf32> to vector<1x128xf32>
    %91 = vector.shape_cast %88 : vector<1x128xf32> to vector<1x1x128xf32>
    tpu.vector_store %arg5[%c0_22, %c0_23, %c0_24], %91 {strides = array<i32>} : memref<1x1x128xf32, #tpu.memory_space<vmem>>, vector<1x1x128xf32>,
    return
  }
  func.func @transform_0(%arg0: i32) -> (i32, i32, i32) {
    %c0_i32 = arith.constant 0 : i32
    %c0_i32_0 = arith.constant 0 : i32
    %c0_i32_1 = arith.constant 0 : i32
    return %arg0, %c0_i32, %c0_i32_0 : i32, i32, i32
  }
  func.func @transform_1(%arg0: i32) -> (i32, i32, i32) {
    %c0_i32 = arith.constant 0 : i32
    %c0_i32_0 = arith.constant 0 : i32
    %c0_i32_1 = arith.constant 0 : i32
    return %arg0, %c0_i32, %c0_i32_0 : i32, i32, i32
  }
  func.func @transform_2(%arg0: i32) -> (i32, i32, i32) {
    %c0_i32 = arith.constant 0 : i32
    %c0_i32_0 = arith.constant 0 : i32
    %c0_i32_1 = arith.constant 0 : i32
    return %arg0, %c0_i32, %c0_i32_0 : i32, i32, i32
  }
  func.func @transform_3(%arg0: i32) -> (i32, i32, i32) {
    %c0_i32 = arith.constant 0 : i32
    %c0_i32_0 = arith.constant 0 : i32
    %c0_i32_1 = arith.constant 0 : i32
    return %arg0, %c0_i32, %c0_i32_0 : i32, i32, i32
  }
  func.func @transform_4(%arg0: i32) -> (i32, i32, i32) {
    %c0_i32 = arith.constant 0 : i32
    %c0_i32_0 = arith.constant 0 : i32
    %c0_i32_1 = arith.constant 0 : i32
    return %arg0, %c0_i32, %c0_i32_0 : i32, i32, i32
  }
}

</mosaic_0001>

<bundles_post_ra>
// kernel: neg.1
= control target key start
LH: loop header
LB: loop body
LE: loop exit
PB: predicated region body
PF: predicated region fallthrough
CT: control target
= control target key end

     0   :  { %s24_s0 = inlined_call_operand.vmem [shape: f32[2,128], index: 0, kind: input, shape index: {}]   ;;  %s25_s1 = inlined_call_operand.vmem [shape: f32[2,128], index: 1, kind: output, shape index: {}]  }
   0x1   :  { %v2_v0 = vld [vmem:[%s24_s0] sm:$0x3] }
   0x2   :  { %v5_v1 = vxor.u32 2147483648, %v2_v0 }
   0x4   :  { %7 = vst [vmem:[%s25_s1] sm:$0x3] %v5_v1 }

// kernel: boxlist_compose_hnms_forward.1
= control target key start
LH: loop header
LB: loop body
LE: loop exit
PB: predicated region body
PF: predicated region fallthrough
CT: control target
= control target key end

     0   :  { %s1570_s15 = smov 0   ;;  %s2917_s0 = inlined_call_operand.vmem [shape: f32[2,5,128], index: 0, kind: input, shape index: {}]   ;;  %s2918_s1 = inlined_call_operand.vmem [shape: f32[2,128,5], index: 1, kind: input, shape index: {}]   ;;  %s2919_s2 = inlined_call_operand.vmem [shape: s32[2,4,128], index: 2, kind: input, shape index: {}]   ;;  %s2920_s3 = inlined_call_operand.vmem [shape: s32[2,128,4], index: 3, kind: input, shape index: {}]   ;;  %s2921_s4 = inlined_call_operand.vmem [shape: f32[2,1,128], index: 4, kind: output, shape index: {}]  }
   0x1 LB: > { %s1403_s16 = sadd.s32 4294967295, %s1525_s15   ;;  %p1407_p0 = scmp.ge.s32.totalorder %s1525_s15, 1  ;;  %s1525_s15 = sphi %s1570_s15, %s14_s15  }
   0x2   : > { %p190_p1 = scmp.lt.s32.totalorder %s1525_s15, 3 }
   0x4   : > { %p191_p2 = pnand %p1407_p0, %p190_p1 }
   0x6   : > { %194 = sbr.rel (%p191_p2) target bundleno = 903 (0x387), region = 36 }
   0xb   : > { %p227_p3 = scmp.lt.s32.totalorder %s1403_s16, 1  ;;  %v2922_v0 = vmov 1   ;;  %v1536_v1 = vmov 0   ;;  %v2924_v13 = vmov 3   ;;  %v1538_v19 = vmov 2   ;;  %s2868_s9 = smov 0  }
   0xc   : > { %1490 = vset.pattern.permute.xlu0 %v2922_v0  ;;  %1487 = vset.pattern.permute.xlu2 %v1536_v1  ;;  %v2971_v43 = vmov 0  ;;  %v2973_v47 = vmov 0  ;;  %v2975_v57 = vmov 0  ;;  %v2977_v63 = vmov 0 }
   0xd   : > { %1486 = vset.pattern.permute.xlu1 %v1536_v1  ;;  %s3163_s16 = smov (!%p227_p3, %s1403_s16), 1  ;;  %v3049_v38 = vmov 0 }
   0xe   : > { %s1448_s17 = sshll.u32 %s3163_s16, 7  ;;  %s247_s20 = scalar_lea.vmem %s2921_s4, %s3163_s16 }
   0xf   : > { %s1593_s23 = scalar_lea.vmem %s2920_s3, %s1448_s17  ;;  %s1702_s26 = scalar_lea.vmem %s2918_s1, %s1448_s17 }
  0x10   : > { %v1596_v2 = vld [vmem:[%s1593_s23 + $0x20] sm:$0xff]  ;;  %v1599_v3 = vld [vmem:[%s1593_s23 + $0x10] sm:$0xff]  ;;  %v1605_v4 = vld [vmem:[%s1593_s23 + $0x28] sm:$0xff]  ;;  %s1411_s27 = sshll.u32 %s3163_s16, 2  ;;  %s1408_s5 = sshll.u32 %s3163_s16, 3 }
  0x11   : > { %331 = vperm.xlu2 %1487, %v1596_v2   ;;  %390 = vperm.xlu0 %1490, %v1599_v3   ;;  %v1608_v5 = vld [vmem:[%s1593_s23 + $0x38] sm:$0xff]  ;;  %v1617_v7 = vld [vmem:[%s1593_s23 + $0x40] sm:$0xff]  ;;  %v1620_v8 = vld [vmem:[%s1593_s23 + $0x50] sm:$0xff]  ;;  %s239_s30 = scalar_lea.vmem %s2919_s2, %s1411_s27  ;;  %s230_s8 = scalar_lea.vmem %s2917_s0, %s1408_s5 }
  0x12   : > { %325 = vperm.xlu1 %1486, %v1599_v3   ;;  %v1611_v6 = vld [vmem:[%s1593_s23 + $0x18] sm:$0xff]  ;;  %v1629_v10 = vld [vmem:[%s1593_s23 + $0x68] sm:$0xff]  ;;  %v1635_v11 = vld [vmem:[%s1593_s23 + $0x70] sm:$0xff] }
  0x13   : > { %v1626_v9 = vld [vmem:[%s1593_s23 + $0x58] sm:$0xff]  ;;  %v1638_v12 = vld [vmem:[%s1593_s23 + $0x8] sm:$0xff]  ;;  %v1645_v14 = vld [vmem:[%s1593_s23 + $0x30] sm:$0xff] }
  0x14   : > { %v1648_v15 = vld [vmem:[%s1593_s23] sm:$0xff]  ;;  %v1656_v16 = vld [vmem:[%s1593_s23 + $0x48] sm:$0xff]  ;;  %v1668_v18 = vld [vmem:[%s1593_s23 + $0x78] sm:$0xff] }
  0x15   : > { %v1662_v17 = vld [vmem:[%s1593_s23 + $0x60] sm:$0xff]  ;;  %v1705_v23 = vld [vmem:[%s1702_s26 + $0x10] sm:$0xff]  ;;  %v1718_v27 = vld [vmem:[%s1702_s26 + $0x38] sm:$0xff] }
  0x16   : > { %v1730_v31 = vld [vmem:[%s239_s30] sm:$0xf]  ;;  %v1736_v33 = vld [vmem:[%s1702_s26 + $0x50] sm:$0xff]  ;;  %v1754_v39 = vld [vmem:[%s1702_s26 + $0x68] sm:$0xff] }
  0x17   : > { %v1733_v32 = vperm.slane %v1730_v31, 1  ;;  %v1739_v34 = vperm.slane %v1730_v31, 0  ;;  %v1815_v58 = vld [vmem:[%s1702_s26 + $0x8] sm:$0xff]  ;;  %v1820_v60 = vld [vmem:[%s1702_s26] sm:$0xff] }
  0x19   : > { %334 = vperm.xlu2 %1487, %v1605_v4   ;;  %405 = vperm.xlu0 %1490, %v1608_v5  }
  0x1a   : > { %328 = vperm.xlu1 %1486, %v1611_v6  }
  0x21   : > { %343 = vperm.xlu2 %1487, %v1617_v7   ;;  %414 = vperm.xlu0 %1490, %v1620_v8  }
  0x22   : > { %340 = vperm.xlu1 %1486, %v1608_v5  }
  0x29   : > { %352 = vperm.xlu2 %1487, %v1626_v9   ;;  %423 = vperm.xlu0 %1490, %v1629_v10  }
  0x2a   : > { %349 = vperm.xlu1 %1486, %v1620_v8  }
  0x31   : > { %361 = vperm.xlu2 %1487, %v1635_v11   ;;  %1494 = vset.pattern.permute.xlu0 %v2924_v13 }
  0x32   : > { %358 = vperm.xlu1 %1486, %v1629_v10   ;;  %533 = vperm.xlu0 %1494, %v1638_v12  }
  0x39   : > { %1489 = vset.pattern.permute.xlu2 %v2922_v0 }
  0x3a   : > { %1488 = vset.pattern.permute.xlu1 %v2922_v0  ;;  %548 = vperm.xlu0 %1494, %v1645_v14  }
  0x3b   : > { %387 = vperm.xlu2 %1489, %v1638_v12   ;;  %384 = vperm.xlu1 %1488, %v1648_v15  }
  0x42   : > { %557 = vperm.xlu0 %1494, %v1656_v16  }
  0x43   : > { %396 = vperm.xlu2 %1489, %v1596_v2   ;;  %393 = vperm.xlu1 %1488, %v1611_v6  }
  0x4a   : > { %566 = vperm.xlu0 %1494, %v1662_v17  }
  0x4b   : > { %402 = vperm.xlu2 %1489, %v1645_v14   ;;  %399 = vperm.xlu1 %1488, %v1605_v4  }
  0x52   : > { %575 = vperm.xlu0 %1494, %v1668_v18  }
  0x53   : > { %411 = vperm.xlu2 %1489, %v1656_v16   ;;  %408 = vperm.xlu1 %1488, %v1617_v7  }
  0x5a   : > { %1496 = vset.pattern.permute.xlu0 %v1538_v19 }
  0x5b   : > { %420 = vperm.xlu2 %1489, %v1662_v17   ;;  %417 = vperm.xlu1 %1488, %v1626_v9  }
  0x5c   : > { %465 = vperm.xlu0 %1496, %v1648_v15  }
  0x63   : > { %429 = vperm.xlu2 %1489, %v1668_v18   ;;  %426 = vperm.xlu1 %1488, %v1635_v11  }
  0x64   : > { %480 = vperm.xlu0 %1496, %v1605_v4  }
  0x6b   : > { %1492 = vset.pattern.permute.xlu2 %v1538_v19  ;;  %1491 = vset.pattern.permute.xlu1 %v1538_v19  ;;  %v1682_v20 = vpop.permute.xlu2 %331 }
  0x6c   : > { %471 = vperm.xlu2 %1492, %v1599_v3   ;;  %489 = vperm.xlu0 %1496, %v1617_v7  }
  0x6d   : > { %468 = vperm.xlu1 %1491, %v1638_v12  }
  0x73   : > { %v1687_v21 = vpop.permute.xlu2 %334 }
  0x74   : > { %477 = vperm.xlu2 %1492, %v1596_v2   ;;  %498 = vperm.xlu0 %1496, %v1626_v9   ;;  %vm372_vm9 = vcmp.eq.s32.totalorder %v1687_v21, %v1739_v34 }
  0x75   : > { %474 = vperm.xlu1 %1491, %v1611_v6  }
  0x7b   : > { %v1692_v22 = vpop.permute.xlu2 %343 }
  0x7c   : > { %486 = vperm.xlu2 %1492, %v1608_v5   ;;  %507 = vperm.xlu0 %1496, %v1635_v11   ;;  %vm375_vm12 = vcmp.eq.s32.totalorder %v1692_v22, %v1739_v34 }
  0x7d   : > { %483 = vperm.xlu1 %1491, %v1645_v14  }
  0x83   : > { %v1707_v24 = vpop.permute.xlu2 %352  ;;  %v1709_v25 = vpop.permute.xlu0 %390 }
  0x84   : > { %v1711_v26 = vpop.permute.xlu1 %325  ;;  %495 = vperm.xlu2 %1492, %v1620_v8   ;;  %693 = vperm.xlu0 %1496, %v1705_v23   ;;  %vm378_vm15 = vcmp.eq.s32.totalorder %v1707_v24, %v1739_v34  ;;  %v2984_v24 = vmov 0 }
  0x85   : > { %492 = vperm.xlu1 %1491, %v1656_v16  }
  0x8b   : > { %v1723_v28 = vpop.permute.xlu2 %361  ;;  %v406_v29 = vpop.permute.xlu0 %405 }
  0x8c   : > { %v1725_v30 = vpop.permute.xlu1 %328  ;;  %504 = vperm.xlu2 %1492, %v1629_v10   ;;  %718 = vperm.xlu0 %1496, %v1718_v27   ;;  %vm439_vm0 = vcmp.eq.s32.totalorder %v406_v29, %v1733_v32  ;;  %v1904_v29 = vld [vmem:[%s1702_s26 + $0x58] sm:$0xff] }
  0x8d   : > { %501 = vperm.xlu1 %1491, %v1662_v17  }
  0x93   : > { %v415_v35 = vpop.permute.xlu0 %414 }
  0x94   : > { %v341_v36 = vpop.permute.xlu1 %340  ;;  %1493 = vset.pattern.permute.xlu2 %v2924_v13  ;;  %733 = vperm.xlu0 %1496, %v1736_v33   ;;  %vm442_vm3 = vcmp.eq.s32.totalorder %v415_v35, %v1733_v32 }
  0x95   : > { %vm374_vm1 = vcmp.eq.s32.totalorder %v341_v36, %v1739_v34  ;;  %510 = vperm.xlu1 %1491, %v1668_v18   ;;  %v1746_v37 = vpop.permute.xlu2 %387  ;;  %530 = vperm.xlu2 %1493, %v1648_v15  }
  0x96   : > { %vm1749_vm2 = vmand %vm374_vm1, %vm439_vm0 }
  0x9b   : > { %v424_v40 = vpop.permute.xlu0 %423 }
  0x9c   : > { %v350_v41 = vpop.permute.xlu1 %349  ;;  %748 = vperm.xlu0 %1496, %v1754_v39   ;;  %vm445_vm6 = vcmp.eq.s32.totalorder %v424_v40, %v1733_v32  ;;  %v1914_v40 = vld [vmem:[%s1702_s26 + $0x78] sm:$0xff] }
  0x9d   : > { %vm377_vm4 = vcmp.eq.s32.totalorder %v350_v41, %v1739_v34  ;;  %1495 = vset.pattern.permute.xlu1 %v2924_v13  ;;  %v1760_v42 = vpop.permute.xlu2 %396  ;;  %539 = vperm.xlu2 %1493, %v1611_v6   ;;  %2986 = vst [vmem:[#allocation3_spill] sm:$0xff] %v1914_v40  ;;  %v1917_v41 = vld [vmem:[%s1702_s26 + $0x70] sm:$0xff] }
  0x9e   : > { %vm1763_vm5 = vmand %vm377_vm4, %vm442_vm3  ;;  %536 = vperm.xlu1 %1495, %v1599_v3   ;;  %v1840_v3 = vld [vmem:[%s1702_s26 + $0x18] sm:$0xff]  ;;  %vm381_vm3 = vcmp.eq.s32.totalorder %v1723_v28, %v1739_v34  ;;  %v1901_v28 = vld [vmem:[%s1702_s26 + $0x60] sm:$0xff] }
  0x9f   : > { %v2972_v43 = vsel %vm1763_vm5, 4294967295, %v2971_v43 }
  0xa4   : > { %v359_v44 = vpop.permute.xlu1 %358  ;;  %1499 = vset.pattern.permute.xlu0 %v1536_v1  ;;  %v1770_v45 = vpop.permute.xlu0 %533 }
  0xa5   : > { %vm380_vm7 = vcmp.eq.s32.totalorder %v359_v44, %v1739_v34  ;;  %v1773_v46 = vpop.permute.xlu2 %402  ;;  %545 = vperm.xlu2 %1493, %v1605_v4   ;;  %319 = vperm.xlu0 %1499, %v1648_v15   ;;  %v1875_v15 = vperm.slane %v1730_v31, 3 }
  0xa6   : > { %vm1777_vm8 = vmand %vm380_vm7, %vm445_vm6  ;;  %542 = vperm.xlu1 %1495, %v1596_v2   ;;  %v1837_v2 = vld [vmem:[%s1702_s26 + $0x20] sm:$0xff] }
  0xa7   : > { %v2974_v47 = vsel %vm1777_vm8, 4294967295, %v2973_v47  ;;  %vm579_vm7 = vcmp.eq.s32.totalorder %v1770_v45, %v1875_v15 }
  0xac   : > { %v1782_v48 = vpop.permute.xlu0 %548 }
  0xad   : > { %v1784_v49 = vpop.permute.xlu2 %411  ;;  %554 = vperm.xlu2 %1493, %v1617_v7   ;;  %v1787_v50 = vpop.permute.xlu1 %384  ;;  %322 = vperm.xlu0 %1499, %v1638_v12  }
  0xae   : > { %551 = vperm.xlu1 %1495, %v1608_v5  }
  0xb4   : > { %v1791_v51 = vpop.permute.xlu0 %557 }
  0xb5   : > { %v1793_v52 = vpop.permute.xlu2 %420  ;;  %563 = vperm.xlu2 %1493, %v1626_v9   ;;  %v1796_v53 = vpop.permute.xlu1 %393  ;;  %337 = vperm.xlu0 %1499, %v1645_v14   ;;  %v1858_v9 = vld [vmem:[%s1702_s26 + $0x28] sm:$0xff]  ;;  %v2982_v14 = vmov 0 }
  0xb6   : > { %560 = vperm.xlu1 %1495, %v1620_v8   ;;  %v1855_v8 = vld [vmem:[%s1702_s26 + $0x30] sm:$0xff] }
  0xb7   : > { %2981 = vst [vmem:[#allocation2_spill] sm:$0xff] %v1855_v8 }
  0xbc   : > { %v1800_v54 = vpop.permute.xlu0 %566 }
  0xbd   : > { %v1802_v55 = vpop.permute.xlu2 %429  ;;  %572 = vperm.xlu2 %1493, %v1635_v11   ;;  %v400_v56 = vpop.permute.xlu1 %399  ;;  %346 = vperm.xlu0 %1499, %v1656_v16   ;;  %v1878_v16 = vld [vmem:[%s1702_s26 + $0x48] sm:$0xff] }
  0xbe   : > { %569 = vperm.xlu1 %1495, %v1629_v10   ;;  %vm437_vm10 = vcmp.eq.s32.totalorder %v400_v56, %v1733_v32 }
  0xbf   : > { %vm1810_vm11 = vmand %vm372_vm9, %vm437_vm10 }
  0xc0   : > { %v2976_v57 = vsel %vm1810_vm11, 4294967295, %v2975_v57 }
  0xc4   : > { %v1817_v59 = vpop.permute.xlu0 %575 }
  0xc5   : > { %1498 = vset.pattern.permute.xlu2 %v1538_v19  ;;  %v409_v61 = vpop.permute.xlu1 %408  ;;  %355 = vperm.xlu0 %1499, %v1662_v17   ;;  %v1881_v17 = vperm.slane %v1730_v31, 2 }
  0xc6   : > { %1497 = vset.pattern.permute.xlu1 %v1538_v19  ;;  %vm440_vm13 = vcmp.eq.s32.totalorder %v409_v61, %v1733_v32  ;;  %v1828_v62 = vpop.permute.xlu2 %471  ;;  %688 = vperm.xlu2 %1498, %v1815_v58   ;;  %v2987_v61 = vmov 0 }
  0xc7   : > { %vm1831_vm14 = vmand %vm375_vm12, %vm440_vm13  ;;  %683 = vperm.xlu1 %1497, %v1820_v60   ;;  %vm584_vm13 = vcmp.eq.s32.totalorder %v1782_v48, %v1875_v15 }
  0xc8   : > { %v2978_v63 = vsel %vm1831_vm14, 4294967295, %v2977_v63 }
  0xcd   : > { %v418_v4 = vpop.permute.xlu1 %417  ;;  %364 = vperm.xlu0 %1499, %v1668_v18   ;;  %v1884_v18 = vld [vmem:[%s1702_s26 + $0x40] sm:$0xff] }
  0xce   : > { %vm443_vm0 = vcmp.eq.s32.totalorder %v418_v4, %v1733_v32  ;;  %v1846_v5 = vpop.permute.xlu2 %477  ;;  %v466_v6 = vpop.permute.xlu0 %465  ;;  %703 = vperm.xlu2 %1498, %v1837_v2   ;;  %v2989_v4 = vmov 0 }
  0xcf   : > { %vm1849_vm1 = vmand %vm378_vm15, %vm443_vm0  ;;  %698 = vperm.xlu1 %1497, %v1840_v3   ;;  %vm513_vm12 = vcmp.eq.s32.totalorder %v466_v6, %v1881_v17 }
  0xd5   : > { %v427_v10 = vpop.permute.xlu1 %426  ;;  %779 = vperm.xlu0 %1499, %v1820_v60  }
  0xd6   : > { %vm446_vm4 = vcmp.eq.s32.totalorder %v427_v10, %v1733_v32  ;;  %v1864_v11 = vpop.permute.xlu2 %486  ;;  %v1866_v12 = vpop.permute.xlu0 %480  ;;  %713 = vperm.xlu2 %1498, %v1855_v8  }
  0xd7   : > { %vm1869_vm6 = vmand %vm381_vm3, %vm446_vm4  ;;  %708 = vperm.xlu1 %1497, %v1858_v9  }
  0xd8   : > { %v2983_v14 = vsel %vm1869_vm6, 4294967295, %v2982_v14 }
  0xdd   : > { %799 = vperm.xlu0 %1499, %v1858_v9  }
  0xde   : > { %v1889_v19 = vpop.permute.xlu2 %495  ;;  %v1891_v21 = vpop.permute.xlu0 %489  ;;  %728 = vperm.xlu2 %1498, %v1878_v16  }
  0xdf   : > { %v469_v22 = vpop.permute.xlu1 %468  ;;  %723 = vperm.xlu1 %1497, %v1884_v18  }
  0xe0   : > { %vm514_vm9 = vcmp.eq.s32.totalorder %v469_v22, %v1881_v17 }
  0xe1   : > { %vm1896_vm10 = vmand %vm514_vm9, %vm579_vm7  ;;  %vm435_vm7 = vcmp.eq.s32.totalorder %v1796_v53, %v1733_v32  ;;  %vm370_vm9 = vcmp.eq.s32.totalorder %v1725_v30, %v1739_v34 }
  0xe2   : > { %v2985_v24 = vsel %vm1896_vm10, 4294967295, %v2984_v24  ;;  %vm436_vm10 = vcmp.eq.s32.totalorder %v1760_v42, %v1733_v32 }
  0xe5   : > { %811 = vperm.xlu0 %1499, %v1884_v18  }
  0xe6   : > { %v1907_v31 = vpop.permute.xlu2 %504  ;;  %v1909_v35 = vpop.permute.xlu0 %498  ;;  %743 = vperm.xlu2 %1498, %v1901_v28  }
  0xe7   : > { %v475_v36 = vpop.permute.xlu1 %474  ;;  %738 = vperm.xlu1 %1497, %v1904_v29  }
  0xe8   : > { %vm516_vm8 = vcmp.eq.s32.totalorder %v475_v36, %v1881_v17 }
  0xed   : > { %823 = vperm.xlu0 %1499, %v1904_v29  }
  0xee   : > { %v1920_v44 = vpop.permute.xlu0 %507  ;;  %758 = vperm.xlu2 %1498, %v1914_v40  }
  0xef   : > { %v484_v45 = vpop.permute.xlu1 %483  ;;  %753 = vperm.xlu1 %1497, %v1917_v41   ;;  %v531_v56 = vpop.permute.xlu2 %530 }
  0xf0   : > { %vm519_vm15 = vcmp.eq.s32.totalorder %v484_v45, %v1881_v17  ;;  %vm578_vm0 = vcmp.eq.s32.totalorder %v531_v56, %v1875_v15  ;;  %v2997_v45 = vmov 0 }
  0xf1   : > { %vm1929_vm3 = vmand %vm519_vm15, %vm584_vm13  ;;  %vm587_vm13 = vcmp.eq.s32.totalorder %v1791_v51, %v1875_v15 }
  0xf2   : > { %v2988_v61 = vsel %vm1929_vm3, 4294967295, %v2987_v61  ;;  %vm1933_vm4 = vmand %vm513_vm12, %vm578_vm0 }
  0xf3   : > { %v2990_v4 = vsel %vm1933_vm4, 4294967295, %v2989_v4  ;;  %vm1947_vm12 = vmand %vm370_vm9, %vm435_vm7  ;;  %vm518_vm9 = vcmp.eq.s32.totalorder %v1866_v12, %v1881_v17  ;;  %v283_v12 = vlaneseq  ;;  %vm434_vm7 = vcmp.eq.s32.totalorder %v1709_v25, %v1733_v32 }
  0xf5   : > { %835 = vperm.xlu0 %1499, %v1917_v41   ;;  %v2002_v0 = vshrl.u32 %v283_v12, 7 }
  0xf6   : > { %v1940_v6 = vpop.permute.xlu0 %693  ;;  %1501 = vset.pattern.permute.xlu2 %v1536_v1 }
  0xf7   : > { %v493_v48 = vpop.permute.xlu1 %492  ;;  %1500 = vset.pattern.permute.xlu1 %v1536_v1  ;;  %v540_v10 = vpop.permute.xlu2 %539  ;;  %787 = vperm.xlu2 %1501, %v1705_v23   ;;  %v2993_v1 = vmov 0  ;;  %v2095_v25 = vadd.s32 32, %v2002_v0  ;;  %v2223_v7 = vadd.s32 48, %v2002_v0  ;;  %v2405_v30 = vadd.s32 120, %v2002_v0 }
  0xf8   : > { %vm522_vm15 = vcmp.eq.s32.totalorder %v493_v48, %v1881_v17  ;;  %vm581_vm0 = vcmp.eq.s32.totalorder %v540_v10, %v1875_v15  ;;  %783 = vperm.xlu1 %1500, %v1815_v58  }
  0xf9   : > { %vm1957_vm3 = vmand %vm522_vm15, %vm587_vm13  ;;  %3017 = vst [vmem:[#allocation7_spill] sm:$0xff] %v2095_v25 }
  0xfa   : > { %v2994_v1 = vsel %vm1957_vm3, 4294967295, %v2993_v1  ;;  %vm1961_vm5 = vmand %vm516_vm8, %vm581_vm0  ;;  %vm521_vm0 = vcmp.eq.s32.totalorder %v1891_v21, %v1881_v17  ;;  %vm369_vm3 = vcmp.eq.s32.totalorder %v1711_v26, %v1739_v34 }
  0xfd   : > { %1503 = vset.pattern.permute.xlu0 %v2924_v13  ;;  %v2018_v13 = vadd.s32 24, %v2002_v0 }
  0xfe   : > { %v1970_v51 = vpop.permute.xlu0 %718  ;;  %896 = vperm.xlu0 %1503, %v1815_v58  }
  0xff   : > { %v1975_v53 = vpop.permute.xlu1 %501  ;;  %v546_v36 = vpop.permute.xlu2 %545  ;;  %795 = vperm.xlu2 %1501, %v1837_v2   ;;  %3002 = vst [vmem:[#allocation5_spill] sm:$0xff] %v2018_v13 }
 0x100   : > { %vm583_vm8 = vcmp.eq.s32.totalorder %v546_v36, %v1875_v15  ;;  %791 = vperm.xlu1 %1500, %v1840_v3   ;;  %v3000_v36 = vmov 0 }
 0x101   : > { %vm1980_vm13 = vmand %vm518_vm9, %vm583_vm8 }
 0x102   : > { %v2998_v45 = vsel %vm1980_vm13, 4294967295, %v2997_v45 }
 0x106   : > { %v1988_v56 = vpop.permute.xlu0 %733  ;;  %916 = vperm.xlu0 %1503, %v1855_v8  }
 0x107   : > { %2999 = vst [vmem:[#allocation4_spill] sm:$0xff] %v1988_v56  ;;  %v1993_v48 = vpop.permute.xlu1 %510  ;;  %v555_v10 = vpop.permute.xlu2 %554  ;;  %807 = vperm.xlu2 %1501, %v1718_v27  }
 0x108   : > { %vm586_vm9 = vcmp.eq.s32.totalorder %v555_v10, %v1875_v15  ;;  %803 = vperm.xlu1 %1500, %v1855_v8   ;;  %v2015_v10 = vand.u32 127, %v283_v12  ;;  %v2022_v8 = vadd.s32 16, %v2002_v0  ;;  %v3006_v12 = vmov 0 }
 0x109   : > { %vm1998_vm8 = vmand %vm521_vm0, %vm586_vm9  ;;  %vm524_vm9 = vcmp.eq.s32.totalorder %v1909_v35, %v1881_v17  ;;  %v3011_v35 = vmov 0 }
 0x10a   : > { %v3001_v36 = vsel %vm1998_vm8, 4294967295, %v3000_v36  ;;  %3003 = vst [vmem:[#allocation6_spill] sm:$0xff] %v2022_v8  ;;  %vm2024_vm0 = vmand %vm369_vm3, %vm434_vm7  ;;  %vm515_vm3 = vcmp.eq.s32.totalorder %v1828_v62, %v1881_v17  ;;  %vm2934_vm13 = vcmp.lt.s32.totalorder %v2018_v13, %v2015_v10  ;;  %v3009_v62 = vmov 0 }
 0x10b   : > { %vm3008_vm7 = vmor %vm1947_vm12, %vm1961_vm5  ;;  %v2134_v13 = vadd.s32 88, %v2002_v0 }
 0x10d   : > { %3024 = vst [vmem:[#allocation9_spill] sm:$0xff] %v2134_v13 }
 0x10e   : > { %v2012_v21 = vpop.permute.xlu0 %748  ;;  %928 = vperm.xlu0 %1503, %v1878_v16  }
 0x10f   : > { %v564_v56 = vpop.permute.xlu2 %563  ;;  %819 = vperm.xlu2 %1501, %v1736_v33  }
 0x110   : > { %vm589_vm15 = vcmp.eq.s32.totalorder %v564_v56, %v1875_v15  ;;  %v537_v26 = vpop.permute.xlu1 %536  ;;  %815 = vperm.xlu1 %1500, %v1878_v16  }
 0x111   : > { %vm2032_vm8 = vmand %vm524_vm9, %vm589_vm15  ;;  %vm580_vm14 = vcmp.eq.s32.totalorder %v537_v26, %v1875_v15  ;;  %vm2935_vm15 = vcmp.lt.s32.totalorder %v2022_v8, %v2015_v10  ;;  %v2197_v8 = vadd.s32 8, %v2002_v0 }
 0x112   : > { %v3007_v12 = vsel %vm2032_vm8, 4294967295, %v3006_v12  ;;  %vm596_vm11 = vmand %vm515_vm3, %vm580_vm14  ;;  %vm371_vm14 = vcmp.eq.s32.totalorder %v1682_v20, %v1739_v34  ;;  %v3015_v20 = vmov 0 }
 0x113   : > { %vm612_vm9 = vmor %vm2024_vm0, %vm596_vm11  ;;  %vm527_vm0 = vcmp.eq.s32.totalorder %v1920_v44, %v1881_v17  ;;  %v3037_v44 = vmov 1  }
 0x114   : > { %vm2059_vm8 = vmand %vm3008_vm7, %vm2934_vm13  ;;  %vm517_vm7 = vcmp.eq.s32.totalorder %v1846_v5, %v1881_v17 }
 0x115   : > { %v3010_v62 = vsel %vm2059_vm8, 4294967295, %v3009_v62  ;;  %vm2067_vm11 = vmand %vm612_vm9, %vm2935_vm15  ;;  %vm432_vm15 = vcmp.eq.s32.totalorder %v1787_v50, %v1733_v32  ;;  %v2123_v50 = vadd.s32 40, %v2002_v0 }
 0x116   : > { %940 = vperm.xlu0 %1503, %v1901_v28   ;;  %v3012_v35 = vsel %vm2067_vm11, 4294967295, %v3011_v35  ;;  %vm2078_vm12 = vmand %vm371_vm14, %vm436_vm10 }
 0x117   : > { %v573_v42 = vpop.permute.xlu2 %572  ;;  %v320_v22 = vpop.permute.xlu0 %319  ;;  %831 = vperm.xlu2 %1501, %v1754_v39   ;;  %3022 = vst [vmem:[#allocation8_spill] sm:$0xff] %v2123_v50 }
 0x118   : > { %vm592_vm3 = vcmp.eq.s32.totalorder %v573_v42, %v1875_v15  ;;  %v543_v56 = vpop.permute.xlu1 %542  ;;  %827 = vperm.xlu1 %1500, %v1901_v28   ;;  %vm367_vm14 = vcmp.eq.s32.totalorder %v320_v22, %v1739_v34  ;;  %v3023_v42 = vmov 3  }
 0x119   : > { %vm2088_vm9 = vmand %vm527_vm0, %vm592_vm3  ;;  %vm582_vm10 = vcmp.eq.s32.totalorder %v543_v56, %v1875_v15 }
 0x11a   : > { %v3016_v20 = vsel %vm2088_vm9, 4294967295, %v3015_v20  ;;  %vm2097_vm13 = vmand %vm517_vm7, %vm582_vm10  ;;  %vm2941_vm10 = vcmp.lt.s32.totalorder %v2095_v25, %v2015_v10  ;;  %vm520_vm7 = vcmp.eq.s32.totalorder %v1864_v11, %v1881_v17  ;;  %v2156_v25 = vadd.s32 56, %v2002_v0 }
 0x11b   : > { %vm614_vm0 = vmor %vm2078_vm12, %vm2097_vm13  ;;  %vm2945_vm13 = vcmp.lt.s32.totalorder %v2123_v50, %v2015_v10  ;;  %v3035_v11 = vmov 0  ;;  %v2213_v50 = vadd.s32 64, %v2002_v0 }
 0x11c   : > { %vm2107_vm3 = vmand %vm367_vm14, %vm432_vm15  ;;  %vm433_vm15 = vcmp.eq.s32.totalorder %v1746_v37, %v1733_v32  ;;  %v3025_v37 = vmov 0 }
 0x11d   : > { %vm2144_vm5 = vmand %vm614_vm0, %vm2941_vm10  ;;  %vm3031_vm0 = vnez %v2985_v24  ;;  %vm3033_vm10 = vnez %v2998_v45  ;;  %v3040_v45 = vmov 0  ;;  %v3058_v24 = vmov 0 }
 0x11e   : > { %952 = vperm.xlu0 %1503, %v1914_v40   ;;  %v3026_v37 = vsel %vm2144_vm5, 4294967295, %v3025_v37 }
 0x11f   : > { %v323_v26 = vpop.permute.xlu0 %322  ;;  %1502 = vset.pattern.permute.xlu2 %v3023_v42 }
 0x120   : > { %v552_v22 = vpop.permute.xlu1 %551  ;;  %vm368_vm14 = vcmp.eq.s32.totalorder %v323_v26, %v1739_v34  ;;  %839 = vperm.xlu1 %1500, %v1914_v40   ;;  %v2130_v56 = vpop.permute.xlu2 %688  ;;  %892 = vperm.xlu2 %1502, %v1820_v60  }
 0x121   : > { %vm585_vm11 = vcmp.eq.s32.totalorder %v552_v22, %v1875_v15  ;;  %vm2151_vm8 = vmand %vm368_vm14, %vm433_vm15  ;;  %vm2949_vm14 = vcmp.lt.s32.totalorder %v2134_v13, %v2015_v10  ;;  %v2190_v22 = vadd.s32 80, %v2002_v0 }
 0x122   : > { %vm2158_vm9 = vmand %vm520_vm7, %vm585_vm11  ;;  %vm2953_vm11 = vcmp.lt.s32.totalorder %v2156_v25, %v2015_v10  ;;  %vm3032_vm7 = vnez %v2976_v57 }
 0x123   : > { %vm3034_vm6 = vmor %vm3032_vm7, %vm3033_vm10  ;;  %vm2954_vm4 = vcmp.lt.s32.totalorder %v2190_v22, %v2015_v10 }
 0x124   : > { %vm2184_vm12 = vmand %vm3034_vm6, %vm2945_vm13  ;;  %vm3038_vm6 = vnez %v3007_v12  ;;  %vm438_vm13 = vcmp.eq.s32.totalorder %v1773_v46, %v1733_v32  ;;  %v3043_v46 = vmov 0 }
 0x125   : > { %v3036_v11 = vsel %vm2184_vm12, 4294967295, %v3035_v11  ;;  %vm3039_vm10 = vmor %vm1849_vm1, %vm3038_vm6 }
 0x126   : > { %1507 = vset.pattern.permute.xlu0 %v3037_v44  ;;  %vm2208_vm7 = vmand %vm3039_vm10, %vm2949_vm14  ;;  %vm523_vm10 = vcmp.eq.s32.totalorder %v1889_v19, %v1881_v17  ;;  %v2283_v19 = vadd.s32 104, %v2002_v0 }
 0x127   : > { %v338_v57 = vpop.permute.xlu0 %337  ;;  %981 = vperm.xlu0 %1507, %v1705_v23   ;;  %v3041_v45 = vsel %vm2208_vm7, 4294967295, %v3040_v45  ;;  %vm3042_vm1 = vmor %vm1749_vm2, %vm2158_vm9  ;;  %vm3047_vm9 = vnez %v2972_v43  ;;  %v3053_v43 = vmov 0 }
 0x128   : > { %v561_v40 = vpop.permute.xlu1 %560  ;;  %vm373_vm15 = vcmp.eq.s32.totalorder %v338_v57, %v1739_v34  ;;  %1504 = vset.pattern.permute.xlu1 %v3023_v42  ;;  %v2219_v13 = vpop.permute.xlu2 %703  ;;  %904 = vperm.xlu2 %1502, %v1840_v3   ;;  %vm2233_vm6 = vmand %vm3042_vm1, %vm2953_vm11  ;;  %vm2955_vm11 = vcmp.lt.s32.totalorder %v2213_v50, %v2015_v10  ;;  %v3060_v42 = vmov 0  ;;  %vm2964_vm7 = vcmp.lt.s32.totalorder %v2283_v19, %v2015_v10 }
 0x129   : > { %v3044_v46 = vsel %vm2233_vm6, 4294967295, %v3043_v46  ;;  %vm588_vm14 = vcmp.eq.s32.totalorder %v561_v40, %v1875_v15  ;;  %vm2240_vm5 = vmand %vm373_vm15, %vm438_vm13  ;;  %900 = vperm.xlu1 %1504, %v1705_v23   ;;  %vm3048_vm13 = vnez %v2988_v61  ;;  %v2303_v61 = vadd.s32 72, %v2002_v0 }
 0x12a   : > { %vm604_vm12 = vmand %vm523_vm10, %vm588_vm14  ;;  %vm2956_vm14 = vcmp.lt.s32.totalorder %v2223_v7, %v2015_v10  ;;  %vm2957_vm10 = vcmp.lt.s32.totalorder %v2002_v0, %v2015_v10 }
 0x12b   : > { %vm620_vm1 = vmor %vm3047_vm9, %vm604_vm12  ;;  %vm3051_vm12 = vcmp.lt.s32.totalorder %v2197_v8, %v2015_v10  ;;  %vm2962_vm6 = vcmp.lt.s32.totalorder %v2303_v61, %v2015_v10 }
 0x12c   : > { %vm616_vm15 = vmor %vm2240_vm5, %vm3048_vm13  ;;  %vm525_vm13 = vcmp.eq.s32.totalorder %v1975_v53, %v1881_v17 }
 0x12d   : > { %vm2264_vm2 = vmand %vm620_vm1, %vm2954_vm4 }
 0x12e   : > { %v3050_v38 = vsel %vm2264_vm2, 4294967295, %v3049_v38  ;;  %vm3052_vm5 = vmor %vm2151_vm8, %vm3031_vm0  ;;  %vm3055_vm8 = vnez %v2978_v63  ;;  %vm3056_vm0 = vnez %v3001_v36  ;;  %v3064_v63 = vmov 0 }
 0x12f   : > { %vm2276_vm9 = vmand %vm3052_vm5, %vm3051_vm12  ;;  %v347_v40 = vpop.permute.xlu0 %346  ;;  %1001 = vperm.xlu0 %1507, %v1718_v27  }
 0x130   : > { %v3054_v43 = vsel %vm2276_vm9, 4294967295, %v3053_v43  ;;  %vm3057_vm12 = vmor %vm3055_vm8, %vm3056_vm0  ;;  %vm3062_vm8 = vnez %v2990_v4  ;;  %v570_v36 = vpop.permute.xlu1 %569  ;;  %v2329_v26 = vpop.permute.xlu2 %713  ;;  %912 = vperm.xlu2 %1502, %v1858_v9  }
 0x131   : > { %vm2297_vm5 = vmand %vm3057_vm12, %vm2955_vm11  ;;  %vm441_vm11 = vcmp.eq.s32.totalorder %v1784_v49, %v1733_v32  ;;  %908 = vperm.xlu1 %1504, %v1837_v2  }
 0x132   : > { %v3059_v24 = vsel %vm2297_vm5, 4294967295, %v3058_v24  ;;  %vm2308_vm4 = vmand %vm616_vm15, %vm2956_vm14  ;;  %vm590_vm15 = vcmp.eq.s32.totalorder %v1800_v54, %v1875_v15  ;;  %vm376_vm14 = vcmp.eq.s32.totalorder %v347_v40, %v1739_v34  ;;  %v2356_v54 = vadd.s32 96, %v2002_v0 }
 0x133   : > { %v3061_v42 = vsel %vm2308_vm4, 4294967295, %v3060_v42  ;;  %vm3063_vm0 = vmor %vm2107_vm3, %vm3062_vm8  ;;  %vm526_vm8 = vcmp.eq.s32.totalorder %v1907_v31, %v1881_v17  ;;  %vm3068_vm3 = vnez %v2974_v47 }
 0x134   : > { %vm2320_vm12 = vmand %vm3063_vm0, %vm2957_vm10  ;;  %vm591_vm10 = vcmp.eq.s32.totalorder %v570_v36, %v1875_v15 }
 0x135   : > { %v3065_v63 = vsel %vm2320_vm12, 4294967295, %v3064_v63  ;;  %vm2341_vm0 = vmand %vm525_vm13, %vm590_vm15  ;;  %vm3069_vm13 = vnez %v2994_v1 }
 0x136   : > { %vm457_vm1 = vmand %vm376_vm14, %vm441_vm11 }
 0x137   : > { %vm607_vm2 = vmand %vm526_vm8, %vm591_vm10  ;;  %v356_v4 = vpop.permute.xlu0 %355  ;;  %1013 = vperm.xlu0 %1507, %v1736_v33  }
 0x138   : > { %vm623_vm4 = vmor %vm3068_vm3, %vm607_vm2  ;;  %vm379_vm10 = vcmp.eq.s32.totalorder %v356_v4, %v1739_v34  ;;  %v2380_v1 = vpop.permute.xlu2 %728  ;;  %924 = vperm.xlu2 %1502, %v1884_v18  }
 0x139   : > { %vm619_vm15 = vmor %vm457_vm1, %vm3069_vm13  ;;  %vm2963_vm1 = vcmp.lt.s32.totalorder %v2356_v54, %v2015_v10  ;;  %920 = vperm.xlu1 %1504, %v1718_v27   ;;  %v684_v53 = vpop.permute.xlu1 %683 }
 0x13a   : > { %vm2361_vm11 = vmand %vm623_vm4, %vm2964_vm7  ;;  %vm444_vm4 = vcmp.eq.s32.totalorder %v1793_v52, %v1733_v32  ;;  %v2391_v52 = vadd.s32 112, %v2002_v0  ;;  %vm3079_vm7 = vnez %v3016_v20  ;;  %v1540_v20 = vmov 4  }
 0x13b   : > { %vm2368_vm2 = vmand %vm619_vm15, %vm2962_vm6  ;;  %vm528_vm6 = vcmp.eq.s32.totalorder %v1993_v48, %v1881_v17 }
 0x13c   : > { %vm460_vm8 = vmand %vm379_vm10, %vm444_vm4  ;;  %vm593_vm10 = vcmp.eq.s32.totalorder %v1817_v59, %v1875_v15  ;;  %v1539_v59 = vmov 1.0|1.0  }
 0x13d   : > { %vm622_vm13 = vmor %vm460_vm8, %vm2341_vm0  ;;  %vm316_vm0 = vcmp.lt.s32.totalorder %v2391_v52, %v2015_v10  ;;  %v3133_v52 = vmov 0 }
 0x13e   : > { %vm2398_vm15 = vmand %vm622_vm13, %vm2963_vm1  ;;  %vm447_vm13 = vcmp.eq.s32.totalorder %v1802_v55, %v1733_v32 }
 0x13f   : > { %vm2416_vm8 = vmand %vm528_vm6, %vm593_vm10  ;;  %v365_v17 = vpop.permute.xlu0 %364  ;;  %1025 = vperm.xlu0 %1507, %v1754_v39   ;;  %vm2968_vm6 = vcmp.lt.s32.totalorder %v2405_v30, %v2015_v10  ;;  %vm3078_vm10 = vnez %v2983_v14 }
 0x140   : > { %vm382_vm1 = vcmp.eq.s32.totalorder %v365_v17, %v1739_v34  ;;  %v2427_v48 = vpop.permute.xlu2 %743  ;;  %936 = vperm.xlu2 %1502, %v1904_v29   ;;  %vm3080_vm3 = vmor %vm3078_vm10, %vm3079_vm7  ;;  %v2445_v34 = vld [vmem:[%s230_s8] sm:$0x1f]  ;;  %vm3094_vm10 = vnez %v3012_v35 }
 0x141   : > { %vm640_vm14 = vmand %vm3080_vm3, %vm316_vm0  ;;  %932 = vperm.xlu1 %1504, %v1736_v33   ;;  %v2441_v32 = vpop.permute.xlu1 %698  ;;  %v2451_v55 = vperm.slane %v2445_v34, 0  ;;  %v2454_v14 = vperm.slane %v2445_v34, 2  ;;  %vm3088_vm3 = vnez %v3061_v42 }
 0x142   : > { %vm463_vm4 = vmand %vm382_vm1, %vm447_vm13  ;;  %vm3087_vm1 = vnez %v3044_v46  ;;  %vm3093_vm13 = vnez %v3010_v62 }
 0x143   : > { %vm625_vm12 = vmor %vm463_vm4, %vm2416_vm8  ;;  %v762_v12 = vmin.f32 %v684_v53, %v2454_v14  ;;  %vm3091_vm4 = vnez %v3026_v37  ;;  %v766_v46 = vmin.f32 %v2219_v13, %v2454_v14  ;;  %v769_v62 = vmin.f32 %v1970_v51, %v2454_v14  ;;  %v3100_v51 = vld [vmem:[#allocation4_spill] sm:$0xff] }
 0x144   : > { %vm641_vm9 = vmand %vm625_vm12, %vm2968_vm6 }
 0x145   : > { %vm1414_vm5 = vmpackc.low %vm641_vm9, %vm640_vm14  ;;  %vm3082_vm9 = vnez %v3041_v45 }
 0x146   : > { %1415 = vmatpush.bf16.msk.msra.mxu0 %vm1414_vm5, %v1539_v59  ;;  %vm3081_vm7 = vmpackc.low %vm2361_vm11, %vm2398_vm15  ;;  %vm3083_vm5 = vnez %v3050_v38  ;;  %vm3085_vm11 = vnez %v3059_v24  ;;  %v764_v38 = vmin.f32 %v1940_v6, %v2454_v14  ;;  %vm3090_vm15 = vnez %v3036_v11 }
 0x147   : > { %v780_v15 = vpop.permute.xlu0 %779  ;;  %1508 = vset.pattern.permute.xlu0 %v1540_v20  ;;  %vm3084_vm12 = vmpackc.low %vm3082_vm9, %vm3083_vm5  ;;  %vm3096_vm9 = vnez %v3054_v43  ;;  %vm3097_vm5 = vnez %v3065_v63 }
 0x148   : > { %v843_v40 = vmax.f32 %v780_v15, %v2451_v55  ;;  %v2459_v36 = vpop.permute.xlu2 %758  ;;  %948 = vperm.xlu2 %1502, %v1917_v41   ;;  %1102 = vperm.xlu0 %1508, %v1820_v60   ;;  %vm3086_vm14 = vmpackc.low %vm2368_vm2, %vm3085_vm11 }
 0x149   : > { %944 = vperm.xlu1 %1504, %v1754_v39   ;;  %v709_v49 = vpop.permute.xlu1 %708  ;;  %vm3089_vm2 = vmpackc.low %vm3087_vm1, %vm3088_vm3 }
 0x14a   : > { %1417 = vmatpush.bf16.msk.msra.mxu0 %vm3081_vm7, %v1539_v59  ;;  %v2469_v4 = vsub.f32 %v762_v12, %v843_v40  ;;  %v767_v57 = vmin.f32 %v709_v49, %v2454_v14  ;;  %vm3092_vm8 = vmpackc.low %vm3090_vm15, %vm3091_vm4 }
 0x14b   : > { %vm3095_vm7 = vmpackc.low %vm3093_vm13, %vm3094_vm10 }
 0x14e   : > { %1419 = vmatpush.bf16.msk.msra.mxu0 %vm3084_vm12, %v1539_v59  ;;  %vm3098_vm12 = vmpackc.low %vm3096_vm9, %vm3097_vm5 }
 0x14f   : > { %v800_v53 = vpop.permute.xlu0 %799 }
 0x150   : > { %v848_v17 = vmax.f32 %v800_v53, %v2451_v55  ;;  %1506 = vset.pattern.permute.xlu2 %v3037_v44  ;;  %1122 = vperm.xlu0 %1508, %v1858_v9  }
 0x151   : > { %1505 = vset.pattern.permute.xlu1 %v3037_v44  ;;  %v724_v31 = vpop.permute.xlu1 %723  ;;  %v788_v45 = vpop.permute.xlu2 %787  ;;  %977 = vperm.xlu2 %1506, %v1815_v58  }
 0x152   : > { %1421 = vmatpush.bf16.msk.msra.mxu0 %vm3086_vm14, %v1539_v59  ;;  %v2488_v5 = vsub.f32 %v767_v57, %v848_v17  ;;  %v845_v15 = vmax.f32 %v788_v45, %v2451_v55  ;;  %973 = vperm.xlu1 %1505, %v1820_v60   ;;  %v770_v47 = vmin.f32 %v724_v31, %v2454_v14  ;;  %v3099_v31 = vld [vmem:[#allocation2_spill] sm:$0xff] }
 0x153   : > { %vm3102_vm14 = vcmp.lt.s32.totalorder %v2002_v0, %v2015_v10 }
 0x154   : > { %v2493_v44 = vsub.f32 %v764_v38, %v845_v15  ;;  %v772_v15 = vmin.f32 %v3100_v51, %v2454_v14 }
 0x156   : > { %1423 = vmatpush.bf16.msk.msra.mxu0 %vm3089_vm2, %v1539_v59 }
 0x157   : > { %v812_v24 = vpop.permute.xlu0 %811 }
 0x158   : > { %v851_v6 = vmax.f32 %v812_v24, %v2451_v55  ;;  %1134 = vperm.xlu0 %1508, %v1884_v18  }
 0x159   : > { %v739_v12 = vpop.permute.xlu1 %738  ;;  %v796_v60 = vpop.permute.xlu2 %795  ;;  %989 = vperm.xlu2 %1506, %v1837_v2  }
 0x15a   : > { %1425 = vmatpush.bf16.msk.msra.mxu0 %vm3092_vm8, %v1539_v59  ;;  %v2510_v42 = vsub.f32 %v770_v47, %v851_v6  ;;  %v847_v40 = vmax.f32 %v796_v60, %v2451_v55  ;;  %985 = vperm.xlu1 %1505, %v1840_v3   ;;  %v773_v11 = vmin.f32 %v739_v12, %v2454_v14 }
 0x15b   : > { %v763_v6 = vmin.f32 %v2130_v56, %v2454_v14  ;;  %v765_v56 = vmin.f32 %v2441_v32, %v2454_v14  ;;  %v768_v32 = vmin.f32 %v2329_v26, %v2454_v14 }
 0x15c   : > { %v2515_v49 = vsub.f32 %v766_v46, %v847_v40 }
 0x15e   : > { %1427 = vmatpush.bf16.msk.msra.mxu0 %vm3095_vm7, %v1539_v59  ;;  %vm3113_vm7 = vcmp.lt.s32.totalorder %v2213_v50, %v2015_v10 }
 0x15f   : > { %v824_v37 = vpop.permute.xlu0 %823 }
 0x160   : > { %v854_v13 = vmax.f32 %v824_v37, %v2451_v55  ;;  %1146 = vperm.xlu0 %1508, %v1904_v29  }
 0x161   : > { %v754_v53 = vpop.permute.xlu1 %753  ;;  %v808_v57 = vpop.permute.xlu2 %807  ;;  %997 = vperm.xlu2 %1506, %v3099_v31  }
 0x162   : > { %1429 = vmatpush.bf16.msk.msra.mxu0 %vm3098_vm12, %v1539_v59  ;;  %v2532_v35 = vsub.f32 %v773_v11, %v854_v13  ;;  %v850_v17 = vmax.f32 %v808_v57, %v2451_v55  ;;  %993 = vperm.xlu1 %1505, %v1858_v9   ;;  %v776_v43 = vmin.f32 %v754_v53, %v2454_v14 }
 0x163   : > { %v775_v11 = vmin.f32 %v2012_v21, %v2454_v14  ;;  %v3101_v21 = vld [vmem:[#allocation3_spill] sm:$0xff] }
 0x164   : > { %v2537_v45 = vsub.f32 %v769_v62, %v850_v17 }
 0x167   : > { %v836_v38 = vpop.permute.xlu0 %835 }
 0x168   : > { %v857_v63 = vmax.f32 %v836_v38, %v2451_v55  ;;  %1158 = vperm.xlu0 %1508, %v1917_v41   ;;  %v1541_v38 = vmov 1065369472  }
 0x169   : > { %v820_v59 = vpop.permute.xlu2 %819  ;;  %1009 = vperm.xlu2 %1506, %v1878_v16   ;;  %674 = vmatmul.bf16.vlgmr.msra.gmra.mxu0 %v1541_v38 }
 0x16a   : > { %v2544_v24 = vsub.f32 %v776_v43, %v857_v63  ;;  %v853_v47 = vmax.f32 %v820_v59, %v2451_v55  ;;  %1005 = vperm.xlu1 %1505, %v1884_v18   ;;  %v784_v9 = vpop.permute.xlu1 %783 }
 0x16b   : > { %v844_v12 = vmax.f32 %v784_v9, %v2451_v55 }
 0x16c   : > { %v2552_v60 = vsub.f32 %v772_v15, %v853_v47 }
 0x16d   : > { %v2554_v46 = vsub.f32 %v763_v6, %v844_v12 }
 0x170   : > { %v2556_v40 = vpop.permute.xlu0 %896 }
 0x171   : > { %v832_v37 = vpop.permute.xlu2 %831  ;;  %1021 = vperm.xlu2 %1506, %v1901_v28  }
 0x172   : > { %v856_v13 = vmax.f32 %v832_v37, %v2451_v55  ;;  %1017 = vperm.xlu1 %1505, %v1904_v29   ;;  %v792_v18 = vpop.permute.xlu1 %791 }
 0x173   : > { %v846_v53 = vmax.f32 %v792_v18, %v2451_v55  ;;  %v777_v18 = vmin.f32 %v2459_v36, %v2454_v14  ;;  %v877_v36 = vmax.f32 %v2493_v44, 0.0 }
 0x174   : > { %v2566_v57 = vsub.f32 %v775_v11, %v856_v13 }
 0x175   : > { %v2568_v62 = vsub.f32 %v765_v56, %v846_v53 }
 0x178   : > { %v2570_v17 = vpop.permute.xlu0 %916 }
 0x179   : > { %1033 = vperm.xlu2 %1506, %v3101_v21  }
 0x17a   : > { %1029 = vperm.xlu1 %1505, %v1917_v41   ;;  %v804_v43 = vpop.permute.xlu1 %803  ;;  %v2574_v29 = vpop.permute.xlu2 %892  ;;  %v771_v41 = vmin.f32 %v2380_v1, %v2454_v14 }
 0x17b   : > { %v849_v63 = vmax.f32 %v804_v43, %v2451_v55 }
 0x17d   : > { %v2579_v59 = vsub.f32 %v768_v32, %v849_v63 }
 0x180   : > { %v2581_v51 = vpop.permute.xlu0 %928 }
 0x181   : > { %1510 = vset.pattern.permute.xlu2 %v1540_v20 }
 0x182   : > { %1509 = vset.pattern.permute.xlu1 %v1540_v20  ;;  %v816_v15 = vpop.permute.xlu1 %815  ;;  %v2585_v47 = vpop.permute.xlu2 %904  ;;  %1110 = vperm.xlu2 %1510, %v1705_v23   ;;  %v774_v20 = vmin.f32 %v2427_v48, %v2454_v14 }
 0x183   : > { %v852_v9 = vmax.f32 %v816_v15, %v2451_v55  ;;  %1106 = vperm.xlu1 %1509, %v1815_v58  }
 0x185   : > { %v2592_v26 = vsub.f32 %v771_v41, %v852_v9 }
 0x188   : > { %v2594_v6 = vpop.permute.xlu0 %940 }
 0x18a   : > { %v828_v12 = vpop.permute.xlu1 %827  ;;  %v2596_v37 = vpop.permute.xlu2 %912  ;;  %1118 = vperm.xlu2 %1510, %v1837_v2   ;;  %v2617_v2 = vperm.slane %v2445_v34, 1 }
 0x18b   : > { %v855_v11 = vmax.f32 %v828_v12, %v2451_v55  ;;  %1114 = vperm.xlu1 %1509, %v1840_v3   ;;  %v2620_v3 = vperm.slane %v2445_v34, 3 }
 0x18d   : > { %v2603_v1 = vsub.f32 %v774_v20, %v855_v11 }
 0x190   : > { %v2605_v23 = vpop.permute.xlu0 %952 }
 0x192   : > { %v840_v58 = vpop.permute.xlu1 %839  ;;  %v2607_v13 = vpop.permute.xlu2 %924  ;;  %1130 = vperm.xlu2 %1510, %v1718_v27  }
 0x193   : > { %v858_v56 = vmax.f32 %v840_v58, %v2451_v55  ;;  %1126 = vperm.xlu1 %1509, %v3099_v31  }
 0x195   : > { %v2614_v48 = vsub.f32 %v777_v18, %v858_v56  ;;  %v876_v56 = vmax.f32 %v2554_v46, 0.0  ;;  %v885_v46 = vmax.f32 %v2552_v60, 0.0 }
 0x199   : > { %v982_v53 = vpop.permute.xlu0 %981 }
 0x19a   : > { %v2622_v38 = vpop.permute.xlu2 %936  ;;  %v1039_v43 = vmax.f32 %v982_v53, %v2617_v2  ;;  %1142 = vperm.xlu2 %1510, %v1736_v33  }
 0x19b   : > { %1138 = vperm.xlu1 %1509, %v1878_v16   ;;  %v901_v27 = vpop.permute.xlu1 %900  ;;  %v957_v16 = vmin.f32 %v2556_v40, %v2620_v3 }
 0x19c   : > { %v958_v55 = vmin.f32 %v901_v27, %v2620_v3 }
 0x19e   : > { %v1055_v14 = vsub.f32 %v958_v55, %v1039_v43 }
 0x1a0   : > { %v1071_v31 = vmax.f32 %v1055_v14, 0.0 }
 0x1a1   : > { %v1002_v41 = vpop.permute.xlu0 %1001 }
 0x1a2   : > { %v2629_v32 = vpop.permute.xlu2 %948  ;;  %v2631_v63 = vmul.f32 %v1071_v31, %v877_v36  ;;  %1154 = vperm.xlu2 %1510, %v1754_v39   ;;  %v1044_v33 = vmax.f32 %v1002_v41, %v2617_v2 }
 0x1a3   : > { %1150 = vperm.xlu1 %1509, %v1901_v28   ;;  %v909_v15 = vpop.permute.xlu1 %908  ;;  %v882_v28 = vmax.f32 %v2537_v45, 0.0 }
 0x1a4   : > { %v960_v36 = vmin.f32 %v909_v15, %v2620_v3 }
 0x1a9   : > { %v1014_v11 = vpop.permute.xlu0 %1013 }
 0x1aa   : > { %v1047_v43 = vmax.f32 %v1014_v11, %v2617_v2 }
 0x1ab   : > { %1162 = vperm.xlu1 %1509, %v3101_v21   ;;  %v921_v9 = vpop.permute.xlu1 %920  ;;  %v978_v12 = vpop.permute.xlu2 %977 }
 0x1ac   : > { %v963_v44 = vmin.f32 %v921_v9, %v2620_v3  ;;  %v1038_v20 = vmax.f32 %v978_v12, %v2617_v2  ;;  %v879_v9 = vmax.f32 %v2515_v49, 0.0  ;;  %v888_v49 = vmax.f32 %v2566_v57, 0.0 }
 0x1ae   : > { %v1060_v58 = vsub.f32 %v963_v44, %v1044_v33  ;;  %v1054_v39 = vsub.f32 %v957_v16, %v1038_v20 }
 0x1b0   : > { %v1076_v18 = vmax.f32 %v1060_v58, 0.0  ;;  %v1070_v53 = vmax.f32 %v1054_v39, 0.0 }
 0x1b1   : > { %v1026_v33 = vpop.permute.xlu0 %1025 }
 0x1b2   : > { %v2644_v40 = vmul.f32 %v1076_v18, %v882_v28  ;;  %v2646_v27 = vmul.f32 %v1070_v53, %v876_v56  ;;  %v1050_v12 = vmax.f32 %v1026_v33, %v2617_v2  ;;  %v962_v28 = vmin.f32 %v2570_v17, %v2620_v3 }
 0x1b3   : > { %v933_v21 = vpop.permute.xlu1 %932  ;;  %v990_v14 = vpop.permute.xlu2 %989  ;;  %v965_v17 = vmin.f32 %v2581_v51, %v2620_v3  ;;  %v2675_v33 = vperm.slane %v2445_v34, 4 }
 0x1b4   : > { %v966_v55 = vmin.f32 %v933_v21, %v2620_v3  ;;  %v1041_v31 = vmax.f32 %v990_v14, %v2617_v2 }
 0x1b6   : > { %v1063_v41 = vsub.f32 %v966_v55, %v1047_v43  ;;  %v1057_v45 = vsub.f32 %v960_v36, %v1041_v31  ;;  %v881_v43 = vmax.f32 %v2579_v59, 0.0  ;;  %v956_v36 = vmin.f32 %v2574_v29, %v2620_v3 }
 0x1b8   : > { %v1079_v16 = vmax.f32 %v1063_v41, 0.0  ;;  %v1073_v44 = vmax.f32 %v1057_v45, 0.0 }
 0x1ba   : > { %v2654_v20 = vmul.f32 %v1079_v16, %v885_v46  ;;  %v2656_v58 = vmul.f32 %v1073_v44, %v879_v9  ;;  %v1103_v59 = vpop.permute.xlu0 %1102  ;;  %v875_v9 = vmax.f32 %v2469_v4, 0.0  ;;  %v884_v44 = vmax.f32 %v2592_v26, 0.0 }
 0x1bb   : > { %v945_v11 = vpop.permute.xlu1 %944  ;;  %v998_v39 = vpop.permute.xlu2 %997 }
 0x1bc   : > { %v969_v15 = vmin.f32 %v945_v11, %v2620_v3  ;;  %v1043_v18 = vmax.f32 %v998_v39, %v2617_v2  ;;  %v1166_v11 = vadd.f32 %v2675_v33, %v1103_v59  ;;  %v959_v39 = vmin.f32 %v2585_v47, %v2620_v3 }
 0x1be   : > { %v1066_v60 = vsub.f32 %v969_v15, %v1050_v12  ;;  %v1059_v56 = vsub.f32 %v962_v28, %v1043_v18  ;;  %v968_v18 = vmin.f32 %v2594_v6, %v2620_v3  ;;  %v3103_v6 = vmov 0 }
 0x1c0   : > { %v1082_v53 = vmax.f32 %v1066_v60, 0.0  ;;  %v1075_v21 = vmax.f32 %v1059_v56, 0.0 }
 0x1c2   : > { %v2664_v55 = vmul.f32 %v1082_v53, %v888_v49  ;;  %v2666_v14 = vmul.f32 %v1075_v21, %v881_v43  ;;  %v878_v43 = vmax.f32 %v2568_v62, 0.0  ;;  %v1123_v21 = vpop.permute.xlu0 %1122  ;;  %v961_v62 = vmin.f32 %v2596_v37, %v2620_v3 }
 0x1c3   : > { %v1010_v31 = vpop.permute.xlu2 %1009 }
 0x1c4   : > { %v974_v41 = vpop.permute.xlu1 %973  ;;  %v1046_v45 = vmax.f32 %v1010_v31, %v2617_v2 }
 0x1c5   : > { %v1037_v57 = vmax.f32 %v974_v41, %v2617_v2 }
 0x1c6   : > { %v1062_v46 = vsub.f32 %v965_v17, %v1046_v45 }
 0x1c7   : > { %v1053_v16 = vsub.f32 %v956_v36, %v1037_v57  ;;  %v887_v36 = vmax.f32 %v2603_v1, 0.0  ;;  %v971_v1 = vmin.f32 %v2605_v23, %v2620_v3  ;;  %v964_v23 = vmin.f32 %v2607_v13, %v2620_v3 }
 0x1c8   : > { %v1078_v29 = vmax.f32 %v1062_v46, 0.0 }
 0x1c9   : > { %v1069_v12 = vmax.f32 %v1053_v16, 0.0 }
 0x1ca   : > { %v2680_v51 = vmul.f32 %v1078_v29, %v884_v44  ;;  %v890_v44 = vmax.f32 %v2614_v48, 0.0 }
 0x1cb   : > { %v1085_v15 = vmul.f32 %v1069_v12, %v875_v9  ;;  %v1022_v28 = vpop.permute.xlu2 %1021  ;;  %v880_v9 = vmax.f32 %v2488_v5, 0.0 }
 0x1cc   : > { %v986_v34 = vpop.permute.xlu1 %985  ;;  %v1049_v4 = vmax.f32 %v1022_v28, %v2617_v2 }
 0x1cd   : > { %v1182_v60 = vsub.f32 %v1166_v11, %v1085_v15  ;;  %v1040_v26 = vmax.f32 %v986_v34, %v2617_v2  ;;  %v1171_v11 = vadd.f32 %v2675_v33, %v1123_v21 }
 0x1ce   : > { %v1065_v49 = vsub.f32 %v968_v18, %v1049_v4 }
 0x1cf   : > { %v1198_v56 = vmul.f32 0.5, %v1182_v60  ;;  %v1056_v53 = vsub.f32 %v959_v39, %v1040_v26 }
 0x1d0   : > { %v1081_v47 = vmax.f32 %v1065_v49, 0.0 }
 0x1d1   : > { %vm1214_vm11 = vcmp.gt.f32.partialorder %v1085_v15, %v1198_v56  ;;  %v1072_v31 = vmax.f32 %v1056_v53, 0.0  ;;  %v1135_v15 = vpop.permute.xlu0 %1134  ;;  %v883_v56 = vmax.f32 %v2510_v42, 0.0  ;;  %v967_v42 = vmin.f32 %v2622_v38, %v2620_v3 }
 0x1d2   : > { %vm2693_vm1 = vmand %vm1214_vm11, %vm3102_vm14  ;;  %v2699_v17 = vmul.f32 %v1081_v47, %v887_v36  ;;  %v1174_v53 = vadd.f32 %v2675_v33, %v1135_v15 }
 0x1d3   : > { %v3104_v6 = vsel %vm2693_vm1, 4294967295, %v3103_v6  ;;  %v2697_v41 = vmul.f32 %v1072_v31, %v878_v43  ;;  %v1034_v45 = vpop.permute.xlu2 %1033  ;;  %v3105_v43 = vld [vmem:[#allocation8_spill] sm:$0xff] }
 0x1d4   : > { %v994_v57 = vpop.permute.xlu1 %993  ;;  %v1052_v59 = vmax.f32 %v1034_v45, %v2617_v2  ;;  %vm3106_vm2 = vcmp.lt.s32.totalorder %v3105_v43, %v2015_v10  ;;  %v3109_v45 = vld [vmem:[#allocation6_spill] sm:$0xff] }
 0x1d5   : > { %v1042_v0 = vmax.f32 %v994_v57, %v2617_v2  ;;  %vm3110_vm8 = vcmp.lt.s32.totalorder %v3109_v45, %v2015_v10  ;;  %v3111_v57 = vmov 0 }
 0x1d6   : > { %v1068_v46 = vsub.f32 %v971_v1, %v1052_v59 }
 0x1d7   : > { %v1058_v16 = vsub.f32 %v961_v62, %v1042_v0 }
 0x1d8   : > { %v1084_v29 = vmax.f32 %v1068_v46, 0.0 }
 0x1d9   : > { %v1074_v12 = vmax.f32 %v1058_v16, 0.0  ;;  %v1147_v31 = vpop.permute.xlu0 %1146 }
 0x1da   : > { %v2710_v37 = vmul.f32 %v1084_v29, %v890_v44  ;;  %v1177_v44 = vadd.f32 %v2675_v33, %v1147_v31 }
 0x1db   : > { %v1090_v39 = vmul.f32 %v1074_v12, %v880_v9  ;;  %v886_v9 = vmax.f32 %v2532_v35, 0.0  ;;  %v3116_v35 = vld [vmem:[#allocation7_spill] sm:$0xff] }
 0x1dc   : > { %v1006_v28 = vpop.permute.xlu1 %1005  ;;  %v1111_v60 = vpop.permute.xlu2 %1110  ;;  %vm3117_vm12 = vcmp.lt.s32.totalorder %v3116_v35, %v2015_v10 }
 0x1dd   : > { %v1187_v34 = vsub.f32 %v1171_v11, %v1090_v39  ;;  %v1045_v18 = vmax.f32 %v1006_v28, %v2617_v2  ;;  %v1168_v5 = vadd.f32 %v2675_v33, %v1111_v60 }
 0x1df   : > { %v1203_v4 = vmul.f32 0.5, %v1187_v34  ;;  %v1061_v48 = vsub.f32 %v964_v23, %v1045_v18  ;;  %v1184_v26 = vsub.f32 %v1168_v5, %v2631_v63 }
 0x1e1   : > { %vm1219_vm3 = vcmp.gt.f32.partialorder %v1090_v39, %v1203_v4  ;;  %v1077_v49 = vmax.f32 %v1061_v48, 0.0  ;;  %v1200_v21 = vmul.f32 0.5, %v1184_v26  ;;  %v970_v39 = vmin.f32 %v2629_v32, %v2620_v3  ;;  %v1159_v60 = vpop.permute.xlu0 %1158  ;;  %v3120_v26 = vld [vmem:[#allocation9_spill] sm:$0xff] }
 0x1e2   : > { %vm2722_vm15 = vmand %vm1219_vm3, %vm3106_vm2  ;;  %v889_v3 = vmax.f32 %v2544_v24, 0.0  ;;  %v1180_v48 = vadd.f32 %v2675_v33, %v1159_v60  ;;  %vm3121_vm3 = vcmp.lt.s32.totalorder %v3120_v26, %v2015_v10 }
 0x1e3   : > { %v1093_v36 = vmul.f32 %v1077_v49, %v883_v56  ;;  %vm1216_vm4 = vcmp.gt.f32.partialorder %v2631_v63, %v1200_v21  ;;  %v3122_v56 = vmov 0 }
 0x1e4   : > { %v1018_v47 = vpop.permute.xlu1 %1017  ;;  %vm2732_vm13 = vmand %vm1216_vm4, %vm3110_vm8  ;;  %v1119_v59 = vpop.permute.xlu2 %1118  ;;  %vm3124_vm8 = vcmp.lt.s32.totalorder %v2156_v25, %v2015_v10 }
 0x1e5   : > { %v3112_v57 = vsel %vm2732_vm13, 4294967295, %v3111_v57  ;;  %v1190_v62 = vsub.f32 %v1174_v53, %v1093_v36  ;;  %v1048_v1 = vmax.f32 %v1018_v47, %v2617_v2  ;;  %v1170_v0 = vadd.f32 %v2675_v33, %v1119_v59 }
 0x1e6   : > { %v675_v31 = vpop.f32.mrf.mxu0 }
 0x1e7   : > { %v1206_v46 = vmul.f32 0.5, %v1190_v62  ;;  %v1064_v63 = vsub.f32 %v967_v42, %v1048_v1  ;;  %v1186_v16 = vsub.f32 %v1170_v0, %v2656_v58  ;;  %v1542_v62 = vmov 0.0  }
 0x1e9   : > { %vm1222_vm10 = vcmp.gt.f32.partialorder %v1093_v36, %v1206_v46  ;;  %v1080_v38 = vmax.f32 %v1064_v63, 0.0  ;;  %v1202_v12 = vmul.f32 0.5, %v1186_v16 }
 0x1ea   : > { %vm2744_vm9 = vmand %vm1222_vm10, %vm3113_vm7  ;;  %vm679_vm7 = vcmp.lt.f32.partialorder %v675_v31, 0.5 }
 0x1eb   : > { %v1096_v11 = vmul.f32 %v1080_v38, %v886_v9  ;;  %vm1218_vm5 = vcmp.gt.f32.partialorder %v2656_v58, %v1202_v12  ;;  %v2782_v25 = vsel %vm679_vm7, 1.0, %v1542_v62  }
 0x1ec   : > { %v1030_v15 = vpop.permute.xlu1 %1029  ;;  %vm2754_vm11 = vmand %vm1218_vm5, %vm3117_vm12  ;;  %v1131_v34 = vpop.permute.xlu2 %1130 }
 0x1ed   : > { %v1193_v50 = vsub.f32 %v1177_v44, %v1096_v11  ;;  %v1051_v23 = vmax.f32 %v1030_v15, %v2617_v2  ;;  %v1173_v18 = vadd.f32 %v2675_v33, %v1131_v34  ;;  %v3138_v15 = vld [vmem:[#allocation5_spill] sm:$0xff] }
 0x1ee   : > { %v677_v9 = vpop.f32.mrf.mxu0 }
 0x1ef   : > { %v1209_v5 = vmul.f32 0.5, %v1193_v50  ;;  %v1067_v58 = vsub.f32 %v970_v39, %v1051_v23  ;;  %v1189_v4 = vsub.f32 %v1173_v18, %v2644_v40  ;;  %v3140_v39 = vmov 0 }
 0x1f1   : > { %vm1225_vm14 = vcmp.gt.f32.partialorder %v1096_v11, %v1209_v5  ;;  %v1083_v32 = vmax.f32 %v1067_v58, 0.0  ;;  %v1205_v2 = vmul.f32 0.5, %v1189_v4 }
 0x1f2   : > { %vm2766_vm2 = vmand %vm1225_vm14, %vm3121_vm3 }
 0x1f3   : > { %v3123_v56 = vsel %vm2766_vm2, 4294967295, %v3122_v56  ;;  %v1099_v49 = vmul.f32 %v1083_v32, %v889_v3  ;;  %vm1221_vm4 = vcmp.gt.f32.partialorder %v2644_v40, %v1205_v2 }
 0x1f4   : > { %vm2774_vm10 = vmand %vm1221_vm4, %vm3124_vm8  ;;  %v1143_v43 = vpop.permute.xlu2 %1142  ;;  %vm3129_vm4 = vcmp.lt.s32.totalorder %v2190_v22, %v2015_v10 }
 0x1f5   : > { %v1196_v53 = vsub.f32 %v1180_v48, %v1099_v49  ;;  %v1107_v21 = vpop.permute.xlu1 %1106  ;;  %v1176_v36 = vadd.f32 %v2675_v33, %v1143_v43 }
 0x1f6   : > { %v1167_v47 = vadd.f32 %v2675_v33, %v1107_v21 }
 0x1f7   : > { %v1212_v42 = vmul.f32 0.5, %v1196_v53  ;;  %v1192_v45 = vsub.f32 %v1176_v36, %v2654_v20 }
 0x1f8   : > { %v1183_v40 = vsub.f32 %v1167_v47, %v2646_v27 }
 0x1f9   : > { %vm1228_vm5 = vcmp.gt.f32.partialorder %v1099_v49, %v1212_v42  ;;  %v1208_v59 = vmul.f32 0.5, %v1192_v45 }
 0x1fa   : > { %vm2787_vm12 = vmand %vm1228_vm5, %vm316_vm0  ;;  %v1199_v0 = vmul.f32 0.5, %v1183_v40  ;;  %vm3132_vm0 = vcmp.lt.s32.totalorder %v2197_v8, %v2015_v10  ;;  %v3136_v8 = vmov 0 }
 0x1fb   : > { %vm1224_vm14 = vcmp.gt.f32.partialorder %v2654_v20, %v1208_v59 }
 0x1fc   : > { %vm1215_vm3 = vcmp.gt.f32.partialorder %v2646_v27, %v1199_v0  ;;  %vm2796_vm8 = vmand %vm1224_vm14, %vm3129_vm4  ;;  %v1155_v63 = vpop.permute.xlu2 %1154 }
 0x1fd   : > { %v1115_v16 = vpop.permute.xlu1 %1114  ;;  %vm2803_vm7 = vmand %vm1215_vm3, %vm3132_vm0  ;;  %v1179_v20 = vadd.f32 %v2675_v33, %v1155_v63  ;;  %vm3135_vm3 = vcmp.lt.s32.totalorder %v2283_v19, %v2015_v10  ;;  %vm3139_vm0 = vcmp.lt.s32.totalorder %v3138_v15, %v2015_v10 }
 0x1fe   : > { %v3134_v52 = vsel %vm2803_vm7, 4294967295, %v3133_v52  ;;  %v1169_v27 = vadd.f32 %v2675_v33, %v1115_v16 }
 0x1ff   : > { %v1195_v22 = vsub.f32 %v1179_v20, %v2664_v55 }
 0x200   : > { %v1185_v38 = vsub.f32 %v1169_v27, %v2697_v41 }
 0x201   : > { %v1211_v44 = vmul.f32 0.5, %v1195_v22 }
 0x202   : > { %v1201_v12 = vmul.f32 0.5, %v1185_v38 }
 0x203   : > { %vm1227_vm5 = vcmp.gt.f32.partialorder %v2664_v55, %v1211_v44 }
 0x204   : > { %vm1217_vm14 = vcmp.gt.f32.partialorder %v2697_v41, %v1201_v12  ;;  %vm2816_vm4 = vmand %vm1227_vm5, %vm3135_vm3  ;;  %vm3142_vm5 = vcmp.lt.s32.totalorder %v2223_v7, %v2015_v10 }
 0x205   : > { %v3137_v8 = vsel %vm2816_vm4, 4294967295, %v3136_v8  ;;  %v1127_v11 = vpop.permute.xlu1 %1126  ;;  %vm2823_vm6 = vmand %vm1217_vm14, %vm3139_vm0  ;;  %vm3145_vm0 = vcmp.lt.s32.totalorder %v2303_v61, %v2015_v10 }
 0x206   : > { %v3141_v39 = vsel %vm2823_vm6, 4294967295, %v3140_v39  ;;  %v1172_v35 = vadd.f32 %v2675_v33, %v1127_v11 }
 0x208   : > { %v1188_v55 = vsub.f32 %v1172_v35, %v2666_v14 }
 0x20a   : > { %v1204_v41 = vmul.f32 0.5, %v1188_v55 }
 0x20c   : > { %vm1220_vm7 = vcmp.gt.f32.partialorder %v2666_v14, %v1204_v41  ;;  %v3146_v14 = vmov 0 }
 0x20d   : > { %vm2833_vm3 = vmand %vm1220_vm7, %vm3142_vm5  ;;  %v1139_v50 = vpop.permute.xlu1 %1138  ;;  %vm3148_vm5 = vcmp.lt.s32.totalorder %v2356_v54, %v2015_v10  ;;  %v1527_v54 = vmov %v2782_v25  }
 0x20e   : > { %v1175_v23 = vadd.f32 %v2675_v33, %v1139_v50 }
 0x210   : > { %v1191_v34 = vsub.f32 %v1175_v23, %v2680_v51 }
 0x212   : > { %v1207_v18 = vmul.f32 0.5, %v1191_v34 }
 0x214   : > { %vm1223_vm14 = vcmp.gt.f32.partialorder %v2680_v51, %v1207_v18  ;;  %v3149_v51 = vmov 0 }
 0x215   : > { %vm2843_vm1 = vmand %vm1223_vm14, %vm3145_vm0  ;;  %v1151_v7 = vpop.permute.xlu1 %1150  ;;  %vm3151_vm0 = vcmp.lt.s32.totalorder %v2405_v30, %v2015_v10 }
 0x216   : > { %v3147_v14 = vsel %vm2843_vm1, 4294967295, %v3146_v14  ;;  %v1178_v60 = vadd.f32 %v2675_v33, %v1151_v7 }
 0x218   : > { %v1194_v5 = vsub.f32 %v1178_v60, %v2699_v17 }
 0x21a   : > { %v1210_v58 = vmul.f32 0.5, %v1194_v5 }
 0x21c   : > { %vm1226_vm7 = vcmp.gt.f32.partialorder %v2699_v17, %v1210_v58 }
 0x21d   : > { %vm2853_vm6 = vmand %vm1226_vm7, %vm3148_vm5  ;;  %v1163_v61 = vpop.permute.xlu1 %1162 }
 0x21e   : > { %v3150_v51 = vsel %vm2853_vm6, 4294967295, %v3149_v51  ;;  %v1181_v4 = vadd.f32 %v2675_v33, %v1163_v61 }
 0x220   : > { %v1197_v3 = vsub.f32 %v1181_v4, %v2710_v37 }
 0x222   : > { %v1213_v32 = vmul.f32 0.5, %v1197_v3 }
 0x224   : > { %vm1229_vm14 = vcmp.gt.f32.partialorder %v2710_v37, %v1213_v32 }
 0x225   : > { %vm2863_vm13 = vmand %vm1229_vm14, %vm3151_vm0 }
 0x226 LB: >> { %vm1430_vm7 = vmpackc.low %vm2863_vm13, %vm2787_vm12  ;;  %v1543_v10 = vmov 1.0|1.0   ;;  %vm3154_vm6 = vnez %v3150_v51  ;;  %vm3155_vm4 = vnez %v3137_v8  ;;  %vm3156_vm2 = vnez %v3123_v56  ;;  %s1308_s9 = sadd.s32 1, %s1533_s9   ;;  %s1533_s9 = sphi %s2868_s9, %s1308_s9   ;;  %v1529_v54 = vphi %v1527_v54, %v1528_v54  }
 0x227   : >> { %1431 = vmatpush.bf16.msk.msra.mxu0 %vm1430_vm7, %v1543_v10  ;;  %vm1432_vm5 = vmpackc.low %vm3155_vm4, %vm3154_vm6  ;;  %vm3157_vm1 = vnez %v3147_v14  ;;  %v1279_v30 = vpack.c.bf16 %v1529_v54, %v1529_v54  ;;  %v1544_v37 = vmov 0.0   ;;  %p1274_p5 = scmp.lt.s32.totalorder %s1308_s9, 128 }
 0x228   : >> { %vm1434_vm14 = vmpackc.low %vm3156_vm2, %vm2796_vm8  ;;  %vm3159_vm2 = vnez %v3141_v39 }
 0x229   : >> { %vm1436_vm0 = vmpackc.low %vm3157_vm1, %vm2744_vm9  ;;  %vm3161_vm1 = vnez %v3134_v52 }
 0x22a   : >> { %vm1438_vm7 = vmpackc.low %vm2774_vm10, %vm2833_vm3 }
 0x22b   : >> { %1433 = vmatpush.bf16.msk.msra.mxu0 %vm1432_vm5, %v1543_v10  ;;  %vm1440_vm5 = vmpackc.low %vm2722_vm15, %vm2754_vm11 }
 0x22f   : >> { %1435 = vmatpush.bf16.msk.msra.mxu0 %vm1434_vm14, %v1543_v10  ;;  %vm3158_vm14 = vnez %v3112_v57 }
 0x230   : >> { %vm1442_vm4 = vmpackc.low %vm3159_vm2, %vm3158_vm14 }
 0x233   : >> { %1437 = vmatpush.bf16.msk.msra.mxu0 %vm1436_vm0, %v1543_v10  ;;  %vm3160_vm0 = vnez %v3104_v6 }
 0x234   : >> { %vm1444_vm6 = vmpackc.low %vm3161_vm1, %vm3160_vm0 }
 0x237   : >> { %1439 = vmatpush.bf16.msk.msra.mxu0 %vm1438_vm7, %v1543_v10 }
 0x23b   : >> { %1441 = vmatpush.bf16.msk.msra.mxu0 %vm1440_vm5, %v1543_v10 }
 0x23f   : >> { %1443 = vmatpush.bf16.msk.msra.mxu0 %vm1442_vm4, %v1543_v10 }
 0x243   : >> { %1445 = vmatpush.bf16.msk.msra.mxu0 %vm1444_vm6, %v1543_v10 }
 0x246   : >> { %1288 = vmatmul.bf16.vlgmr.msra.gmra.mxu0 %v1279_v30 }
 0x2c3   : >> { %v1289_v33 = vpop.f32.mrf.mxu0 }
 0x2c4   : >> { %vm1293_vm7 = vcmp.lt.f32.partialorder %v1289_v33, 0.5 }
 0x2c5   : >> { %v1294_v48 = vsel %vm1293_vm7, 1.0, %v1544_v37 }
 0x2c6   : >> { %v1295_v26 = vmul.f32 %v1294_v48, %v2782_v25  }
 0x2c8   : >> { %v1296_v2 = vsub.f32 %v1295_v26, %v1529_v54  ;;  %v1528_v54 = vmov %v1295_v26  }
 0x2ca   : >> { %v1297_v49 = vand.u32 2147483647, %v1296_v2 }
 0x2cb   : >> { %v1291_v53 = vpop.f32.mrf.mxu0 }
 0x2cc   : >> { %1298 = vmax.xlane.f32.xlu0 %v1297_v49 }
 0x33f   : >> { %v1299_v43 = vpop.xlane.xlu0 %1298 }
 0x340   : >> { %v1300_v21 = vrot.slane %v1299_v43, 4 }
 0x342   : >> { %v1301_v36 = vmax.f32 %v1299_v43, %v1300_v21 }
 0x344   : >> { %v1302_v47 = vrot.slane %v1301_v36, 2 }
 0x346   : >> { %v1303_v31 = vmax.f32 %v1301_v36, %v1302_v47 }
 0x348   : >> { %v1304_v42 = vrot.slane %v1303_v31, 1 }
 0x34a   : >> { %v1305_v45 = vmax.f32 %v1303_v31, %v1304_v42 }
 0x34c   : >> { %1450 = vpush %v1305_v45 }
 0x37d   : >> { %s1451_s10 = spop %1450 }
 0x37e   : >> { %p1307_p4 = scmp.gt.f32.partialorder %s1451_s10, 0.0 }
 0x380   : >> { %p1275_p6 = pnand %p1307_p4, %p1274_p5 }
 0x381   : > { %1309 = vst [vmem:[%s247_s20] sm:$0x1] (%p1275_p6), %v1295_v26 }
 0x382   : > { %1278 = sbr.rel (!%p1275_p6) target bundleno = 550 (0x226), region = 82 }
 0x387 PF: > { %s14_s15 = sadd.s32 1, %s1525_s15  }
 0x388   : > { %p11_p7 = scmp.ge.s32.totalorder %s14_s15, 4  }
 0x38a   :  { %13 = sbr.rel (!%p11_p7) target bundleno = 1 (0x1), region = 93 }

</bundles_post_ra>
